<compile_context>
chip_gen: v5e
topology: v5e:2x2
jax: 0.10.0
libtpu: 0.0.40
codegen_flags: <defaults>
</compile_context>

<pallas_src>
import functools
import math

import jax
import jax.numpy as jnp
from jax.experimental import pallas as pl
from jax.experimental.pallas import tpu as pltpu

# Plain Python floats (hoisted: no per-call device sync).
_WAVELETS = {
    "haar": (0.7071067811865476, 0.7071067811865476),
    "rearrange": (1.0, 1.0),
}

_MAX_TILE_ELEMS = 256 * 1024  # per-block elements (~1 MiB f32) -> <~10 MiB live VMEM


def _haar_kernel(x_ref, o_ref, xt_ref, *, levels, h0, h1):
    """Fused multi-level grouped stride-2 Haar DWT on one natural-layout tile.

    x_ref : (1, c_t, l_t)        natural (B, C, L) tile (length on lanes)
    o_ref : (1, P, c_t, l_t//P)  natural (B, P, C, L/P) tile (length on lanes)
    xt_ref: (l_t, c_t) f32       VMEM scratch holding the transposed tile
    """
    P = 1 << levels
    l_t = x_ref.shape[2]
    n = l_t // P

    # (c_t, l_t) -> (l_t, c_t): the lane<->sublane swap happens on-chip via the
    # XLU instead of as an XLA copy through HBM (perf-review item 1).
    xt_ref[...] = jnp.transpose(x_ref[0].astype(jnp.float32))

    # Stride-P phase split along sublanes (native sublane-strided loads, no
    # read amplification): sl[j][i, :] == tile[i*P + j, :].
    phases = [xt_ref[pl.ds(j, n, stride=P), :] for j in range(P)]

    # Level-by-level Haar butterfly.  `blocks` mirrors the channel-block layout
    # produced by torch.cat([xl, xh], dim=1) applied `levels` times.
    same_tap = h0 == h1
    a, b = h1 * 0.5, h0 * 0.5
    blocks = [phases]
    for _ in range(levels):
        lows, highs = [], []
        for blk in blocks:
            ev, od = blk[0::2], blk[1::2]
            if same_tap:
                # Haar: h0 == h1, so per level only add/sub; uniform rescale is
                # folded into one multiply at the end (perf-review item 6).
                lows.append([e + o for e, o in zip(ev, od)])
                highs.append([e - o for e, o in zip(ev, od)])
            else:
                lows.append([e * a + o * b for e, o in zip(ev, od)])
                highs.append([e * b - o * a for e, o in zip(ev, od)])
        blocks = lows + highs

    scale = (h0 * 0.5) ** levels
    for m in range(P):
        sub = blocks[m][0]                       # (n, c_t) f32
        if same_tap:
            sub = sub * scale
        # Back-transpose per subband -> lane-dense store of width n (>=128).
        o_ref[0, m, :, :] = jnp.transpose(sub).astype(o_ref.dtype)


def _choose_tiles(B, C, L, P):
    """Pick (c_t, l_t) for the (B, C//c_t, L//l_t) grid (Pallas fast path)."""
    unit = 128 * P  # minimum length tile keeping the subband stores lane-dense

    # Channel tile: prefer multiples of 128 (keeps both in-kernel transposes
    # (8,128)-aligned and the butterfly lane-dense); else use all of C.
    c_t = None
    for t in (256, 128):
        if C % t == 0:
            c_t = t
            break
    if c_t is None:
        if C <= 256:
            c_t = C
        else:
            c_t = C
            for t in range(256, 7, -8):
                if C % t == 0:
                    c_t = t
                    break
    # Guard very deep patch sizes from blowing the VMEM budget.
    while c_t > 8 and c_t % 2 == 0 and C % (c_t // 2) == 0 and c_t * unit > 2 * _MAX_TILE_ELEMS:
        c_t //= 2

    # Length tile: largest multiple of `unit` dividing L under the element
    # budget; full L when it fits (=> fully contiguous HBM blocks).
    q = L // unit
    max_k = max(1, min(q, (_MAX_TILE_ELEMS // c_t) // unit))
    k = 1
    for d in range(max_k, 0, -1):
        if q % d == 0:
            k = d
            break
    # Megacore (v7x, 2 TCs): make sure there are >=2 grid steps when possible.
    if B * (C // c_t) * (q // k) == 1 and q > 1:
        for d in range(q // 2, 0, -1):
            if q % d == 0:
                k = d
                break
    return c_t, unit * k


def _haar_patch_pallas(x, levels, h0, h1):
    """x: (B, C, L) -> (B, C * 2**levels, L // 2**levels); all levels fused."""
    P = 1 << levels
    B, C, L = x.shape
    Lp = L // P
    dsize = jnp.dtype(x.dtype).itemsize
    c_t, l_t = _choose_tiles(B, C, L, P)
    n = l_t // P
    grid = (B, C // c_t, L // l_t)

    kernel = functools.partial(_haar_kernel, levels=levels, h0=h0, h1=h1)
    out = pl.pallas_call(
        kernel,
        out_shape=jax.ShapeDtypeStruct((B, P, C, Lp), x.dtype),
        grid_spec=pltpu.PrefetchScalarGridSpec(
            num_scalar_prefetch=0,
            grid=grid,
            # If a trace ever shows exposed input DMA, pipeline_mode=pl.Buffered(3)
            # on this spec is the cheap next step (plenty of VMEM headroom).
            in_specs=[pl.BlockSpec((1, c_t, l_t), lambda bi, ci, li: (bi, ci, li))],
            out_specs=pl.BlockSpec((1, P, c_t, n), lambda bi, ci, li: (bi, 0, ci, li)),
            scratch_shapes=[pltpu.VMEM((l_t, c_t), jnp.float32)],
        ),
        compiler_params=pltpu.CompilerParams(
            dimension_semantics=("parallel", "parallel", "parallel"),
            vmem_limit_bytes=32 * 1024 * 1024,
        ),
        cost_estimate=pl.CostEstimate(
            flops=(2 * levels + 1) * B * C * L,
            transcendentals=0,
            bytes_accessed=2 * B * C * L * dsize,
        ),
    )(x)
    # (B, P, C, Lp) -> (B, P*C, Lp) is metadata-only and matches the torch
    # channel order (subband-major: channel index = m*C + c).
    return out.reshape(B, P * C, Lp)


def _dwt_jax(x, h0, h1, rescale=True):
    """Plain-JAX single-level DWT matching F.conv1d(groups, stride=2) + reflect pad."""
    if x.shape[-1] % 2 == 1:
        # F.pad(x, (0, 1), mode='reflect'): append x[..., -2].
        x = jnp.concatenate([x, x[..., -2:-1]], axis=-1)
    even = x[..., 0::2].astype(jnp.float32)
    odd = x[..., 1::2].astype(jnp.float32)
    xl = even * h1 + odd * h0
    xh = even * h0 - odd * h1
    out = jnp.concatenate([xl, xh], axis=1)
    if rescale:
        out = out * 0.5
    return out.astype(x.dtype)


def _haar_reference(x, levels, h0, h1):
    for _ in range(levels):
        x = _dwt_jax(x, h0, h1, rescale=True)
    return x


def _haar_patch(x, levels, h0, h1):
    if levels <= 0:
        return x
    P = 1 << levels
    B, C, L = x.shape
    # Pallas fast path needs L/P to be a 128-lane multiple (lane-dense stores,
    # aligned in-kernel transposes).  Small / unaligned / odd-length signals
    # (incl. the reflect-pad tail) take the plain-JAX fallback.
    if L % P != 0 or (L // P) % 128 != 0:
        return _haar_reference(x, levels, h0, h1)
    return _haar_patch_pallas(x, levels, h0, h1)


class Patcher1D:
    """JAX/Pallas port of the PyTorch Patcher1D module (forward pass only)."""

    def __init__(self, patch_size=1, patch_method="haar"):
        self.patch_size = patch_size
        self.patch_method = patch_method
        self.wavelets = _WAVELETS[patch_method]
        self._h0, self._h1 = float(self.wavelets[0]), float(self.wavelets[1])
        self.levels = int(math.log2(patch_size)) if patch_size > 1 else 0

    def __call__(self, x):
        if self.patch_method == "haar":
            return _haar_patch(x, self.levels, self._h0, self._h1)
        elif self.patch_method == "rearrange":
            return self._arrange(x)
        raise ValueError("Unknown patch method: " + self.patch_method)

    def _arrange(self, x):
        # 'b c (l p) -> b (c p) l' -- pure layout op, no compute hot path.
        b, c, lp = x.shape
        p = self.patch_size
        l = lp // p
        return x.reshape(b, c, l, p).transpose(0, 1, 3, 2).reshape(b, c * p, l)


if __name__ == "__main__":
    key = jax.random.PRNGKey(0)
    # Small but TPU-shaped: B=2, C=128 channels, L=1024 samples.  L/patch_size
    # stays a multiple of 128 so the Pallas fast path (lane-dense stores,
    # aligned in-kernel transposes) is exercised for every patch size below.
    B, C, L = 2, 128, 1024
    x = jax.random.normal(key, (B, C, L), dtype=jnp.float32)
    h0, h1 = _WAVELETS["haar"]

    # Haar path: 1-, 2- and 3-level fused wavelet-packet patching.
    for patch_size in (2, 4, 8):
        patcher = Patcher1D(patch_size=patch_size, patch_method="haar")
        out = jax.block_until_ready(patcher(x))
        levels = int(math.log2(patch_size))
        ref = _haar_reference(x, levels, h0, h1)
        assert out.shape == (B, C * patch_size, L // patch_size), out.shape
        max_err = float(jnp.max(jnp.abs(out - ref)))
        assert max_err < 1e-5, max_err

    # patch_size=1 is the identity.
    p1 = Patcher1D(patch_size=1, patch_method="haar")
    assert jnp.array_equal(jax.block_until_ready(p1(x)), x)

    # 'rearrange' patch method (pure layout op).
    p2 = Patcher1D(patch_size=4, patch_method="rearrange")
    out2 = jax.block_until_ready(p2(x))
    ref2 = x.reshape(B, C, L // 4, 4).transpose(0, 1, 3, 2).reshape(B, C * 4, L // 4)
    assert out2.shape == (B, C * 4, L // 4), out2.shape
    assert jnp.array_equal(out2, ref2)

    print("KERNEL_OK")
</pallas_src>

<mosaic_0001>
module attributes {stable_mosaic.version = 11 : i64} {
  func.func @_haar_kernel(%arg0: i32, %arg1: i32, %arg2: i32, %arg3: memref<1x128x1024xf32, #tpu.memory_space<vmem>>, %arg4: memref<1x2x128x512xf32, #tpu.memory_space<vmem>>, %arg5: memref<1024x128xf32, #tpu.memory_space<vmem>>) attributes {dimension_semantics = [#tpu.dimension_semantics<parallel>, #tpu.dimension_semantics<parallel>, #tpu.dimension_semantics<parallel>], iteration_bounds = array<i64: 2, 1, 1>, scalar_prefetch = 0 : i64, scratch_operands = 1 : i64, tpu.core_type = #tpu.core_type<tc>, window_params = [{transform_indices = @transform_0, window_bounds = array<i64: 1, 128, 1024>}, {transform_indices = @transform_1, window_bounds = array<i64: 1, 2, 128, 512>}]} {
    %c0 = arith.constant 0 : index
    %c0_0 = arith.constant 0 : index
    %c0_1 = arith.constant 0 : index
    %0 = vector.load %arg3[%c0, %c0_0, %c0_1] : memref<1x128x1024xf32, #tpu.memory_space<vmem>>, vector<1x128x1024xf32>
    %1 = vector.shape_cast %0 : vector<1x128x1024xf32> to vector<128x1024xf32>
    %2 = tpu.transpose %1, [1, 0] : vector<128x1024xf32> -> vector<1024x128xf32>
    %c0_2 = arith.constant 0 : index
    %c0_3 = arith.constant 0 : index
    %3 = vector.load %arg5[%c0_2, %c0_3] : memref<1024x128xf32, #tpu.memory_space<vmem>>, vector<1024x128xf32>
    tpu.vector_store %arg5[%c0_2, %c0_3], %2 {strides = array<i32>} : memref<1024x128xf32, #tpu.memory_space<vmem>>, vector<1024x128xf32>,
    %c0_4 = arith.constant 0 : index
    %c0_5 = arith.constant 0 : index
    %4 = tpu.strided_load %arg5[%c0_4, %c0_5] {strides = array<i32: 2, 1>} : memref<1024x128xf32, #tpu.memory_space<vmem>>, vector<512x128xf32>
    %c1 = arith.constant 1 : index
    %c0_6 = arith.constant 0 : index
    %5 = tpu.strided_load %arg5[%c1, %c0_6] {strides = array<i32: 2, 1>} : memref<1024x128xf32, #tpu.memory_space<vmem>>, vector<512x128xf32>
    %6 = arith.addf %4, %5 : vector<512x128xf32>
    %7 = arith.subf %4, %5 : vector<512x128xf32>
    %cst = arith.constant 0.353553385 : f32
    %8 = vector.broadcast %cst : f32 to vector<512x128xf32>
    %9 = arith.mulf %6, %8 : vector<512x128xf32>
    %10 = tpu.transpose %9, [1, 0] : vector<512x128xf32> -> vector<128x512xf32>
    %c0_7 = arith.constant 0 : index
    %c0_8 = arith.constant 0 : index
    %c0_9 = arith.constant 0 : index
    %c0_10 = arith.constant 0 : index
    %11 = vector.load %arg4[%c0_7, %c0_8, %c0_9, %c0_10] : memref<1x2x128x512xf32, #tpu.memory_space<vmem>>, vector<1x1x128x512xf32>
    %12 = vector.shape_cast %11 : vector<1x1x128x512xf32> to vector<128x512xf32>
    %13 = vector.shape_cast %10 : vector<128x512xf32> to vector<1x1x128x512xf32>
    tpu.vector_store %arg4[%c0_7, %c0_8, %c0_9, %c0_10], %13 {strides = array<i32>} : memref<1x2x128x512xf32, #tpu.memory_space<vmem>>, vector<1x1x128x512xf32>,
    %cst_11 = arith.constant 0.353553385 : f32
    %14 = vector.broadcast %cst_11 : f32 to vector<512x128xf32>
    %15 = arith.mulf %7, %14 : vector<512x128xf32>
    %16 = tpu.transpose %15, [1, 0] : vector<512x128xf32> -> vector<128x512xf32>
    %c0_12 = arith.constant 0 : index
    %c1_13 = arith.constant 1 : index
    %c0_14 = arith.constant 0 : index
    %c0_15 = arith.constant 0 : index
    %17 = vector.load %arg4[%c0_12, %c1_13, %c0_14, %c0_15] : memref<1x2x128x512xf32, #tpu.memory_space<vmem>>, vector<1x1x128x512xf32>
    %18 = vector.shape_cast %17 : vector<1x1x128x512xf32> to vector<128x512xf32>
    %19 = vector.shape_cast %16 : vector<128x512xf32> to vector<1x1x128x512xf32>
    tpu.vector_store %arg4[%c0_12, %c1_13, %c0_14, %c0_15], %19 {strides = array<i32>} : memref<1x2x128x512xf32, #tpu.memory_space<vmem>>, vector<1x1x128x512xf32>,
    return
  }
  func.func @transform_0(%arg0: i32, %arg1: i32, %arg2: i32) -> (i32, i32, i32) {
    %c0_i32 = arith.constant 0 : i32
    return %arg0, %arg1, %arg2 : i32, i32, i32
  }
  func.func @transform_1(%arg0: i32, %arg1: i32, %arg2: i32) -> (i32, i32, i32, i32) {
    %c0_i32 = arith.constant 0 : i32
    %c0_i32_0 = arith.constant 0 : i32
    return %arg0, %c0_i32, %arg1, %arg2 : i32, i32, i32, i32
  }
}

</mosaic_0001>

<bundles_post_ra>
// kernel: tpu_custom_call.1
= control target key start
LH: loop header
LB: loop body
LE: loop exit
PB: predicated region body
PF: predicated region fallthrough
CT: control target
= control target key end

     0   :  { %6 = vsyncpa [#allocation4], 0  ;;  %s3060_s0 = inlined_call_operand.hbm [shape: f32[2,128,1024], index: 0, kind: input, shape index: {}]   ;;  %s3061_s1 = inlined_call_operand.hbm [shape: f32[2,2,128,512], index: 1, kind: output, shape index: {}]  }
   0x1   :  { %8 = vsyncpa [#allocation4 + $0x1], 0 }
   0x2   :  { %9 = vsyncpa [#allocation5], 0 }
   0x3   :  { %11 = vsyncpa [#allocation5 + $0x1], 0  ;;  %s1971_s6 = smov 0   ;;  %s1973_s7 = smov 0  }
   0x4   :  { %s1975_s8 = smov 0   ;;  %s1977_s9 = smov 0  }
   0x5   :  { %s1979_s10 = smov 0   ;;  %s1981_s11 = smov 0  }
   0x6 LB: > { %s1696_s12 = sadd.s32 4294967295, %s1955_s11   ;;  %s1697_s13 = sadd.s32 4294967294, %s1955_s11   ;;  %s1955_s11 = sphi %s1981_s11, %s17_s11   ;;  %s1951_s10 = sphi %s1979_s10, %s3293_s10   ;;  %s1947_s9 = sphi %s1977_s9, %s3292_s9   ;;  %s1943_s8 = sphi %s1975_s8, %s3291_s8   ;;  %s1939_s7 = sphi %s1973_s7, %s3290_s7   ;;  %s1935_s6 = sphi %s1971_s6, %s3289_s6  }
   0x7   : > { %s36_s14 = sadd.s32 1, %s1951_s10  ;;  %s47_s15 = sadd.s32 1, %s1943_s8 }
   0x8   : > { %p38_p0 = scmp.ge.s32.totalorder %s36_s14, 2  ;;  %p54_p1 = scmp.ne.s32.totalorder %s1943_s8, %s1939_s7 }
   0x9   : > { %p55_p2 = scmp.eq.s32.totalorder %s1955_s11, 0  ;;  %p60_p3 = scmp.ne.s32.totalorder %s1939_s7, %s1935_s6 }
   0xa   : > { %s3295_s14 = smov (%p38_p0, %s36_s14), 0  ;;  %p61_p5 = scmp.eq.s32.totalorder %s1696_s12, 0 }
   0xb   : > { %p2012_p4 = por %p55_p2, %p54_p1  ;;  %s40_s17 = ssub.s32 %s1951_s10, %s3295_s14 }
   0xc   : > { %p88_p6 = scmp.eq.s32.totalorder %s1696_s12, 1  ;;  %p45_p7 = scmp.eq.s32.totalorder %s40_s17, 0 }
   0xd   : > { %p2018_p8 = por %p61_p5, %p60_p3  ;;  %p94_p10 = scmp.eq.s32.totalorder %s1697_s13, 1 }
   0xe   : > { %p2022_p9 = por %p88_p6, %p54_p1  ;;  %p1699_p12 = scmp.ge.s32.totalorder %s1955_s11, 2 }
   0xf   : > { %s2027_s20 = scalar_select %p45_p7, %s1943_s8, %s47_s15  }
  0x10   : > { %p2029_p11 = por %p94_p10, %p60_p3  ;;  %p1789_p13 = scmp.lt.s32.totalorder %s1955_s11, 2 }
  0x11   : > { %s114_s22 = sand.u32 1, %s1943_s8   ;;  %s1775_s24 = sshll.u32 %s1951_s10, 10 }
  0x12   : > { %s1700_s23 = sshll.u32 %s114_s22, 10  ;;  %s128_s27 = scalar_lea.hbm %s3060_s0, %s1775_s24 }
  0x13   : > { %s118_s28 = scalar_lea.vmem [#allocation3], %s1700_s23  ;;  %s129_s30 = sshll.u32 %s128_s27, 4  ;;  %s130_s30 = int_to_ptr.hbm [resolvable:$true] %s129_s30 }
  0x14   : > { %s131_s29 = sshll.u32 %s118_s28, 4  ;;  %p1782_p0 = pnand %p1789_p13, %p2012_p4  ;;  %s132_s29 = int_to_ptr.vmem [resolvable:$true] %s131_s29 }
  0x15   : > { %p1703_p1 = scmp.ge.s32.totalorder %s1955_s11, 1  ;;  %s115_s2 = scalar_lea.sflag [#allocation4], %s114_s22 }
  0x16   : > { %s1957_s3 = smov 1024   ;;  %s1958_s4 = smov 64  }
  0x17   : > { %1784 = dma.hbm_to_vmem [thread:$0]  (!%p1782_p0), %s130_s30, 16384, %s132_s29, %s115_s2, %s1957_s3, %s1957_s3, %s1958_s4  }
  0x18   : > { %p139_p2 = scmp.lt.s32.totalorder %s1955_s11, 3 }
  0x1a   : > { %p140_p3 = pnand %p1703_p1, %p139_p2 }
  0x1c   : > { %143 = sbr.rel (%p140_p3) target bundleno = 968 (0x3c8), region = 24 }
  0x21   : > { %s2045_s5 = sand.u32 1, %s1939_s7  }
  0x22   : > { %s1704_s12 = sshll.u32 %s2045_s5, 10  ;;  %s146_s13 = scalar_lea.sflag [#allocation4], %s2045_s5 }
  0x23   : > { %s2051_s15 = scalar_lea.vmem [#allocation3], %s1704_s12 }
  0x24   : > { %1926 = dma.done.wait (%p2018_p8), %s146_s13, 16384  }
  0x25   : > { %1928 = vsyncadd (%p2018_p8), %s146_s13, 4294950912  ;;  %v175_v0 = vld [vmem:[%s2051_s15 + $0x10] sm:$0xff]  ;;  %v174_v1 = vld [vmem:[%s2051_s15 + $0x8] sm:$0xff]  ;;  %s2629_s16 = scalar_lea.vmem [#allocation6], %s1704_s12  ;;  %s1776_s17 = sshll.u32 %s1947_s9, 10 }
  0x26   : > { %v173_v2 = vld [vmem:[%s2051_s15] sm:$0xff]  ;;  %365 = vxpose.xlu2.b32.start [1/16] %v175_v0, 128  ;;  %333 = vxpose.xlu1.b32.start [1/16] %v174_v1, 128  ;;  %v183_v3 = vld [vmem:[%s2051_s15 + $0x50] sm:$0xff]  ;;  %v182_v4 = vld [vmem:[%s2051_s15 + $0x48] sm:$0xff]  ;;  %s1598_s23 = scalar_lea.hbm %s3061_s1, %s1776_s17  ;;  %s1599_s24 = sshll.u32 %s2629_s16, 4  ;;  %s1600_s24 = int_to_ptr.vmem [resolvable:$true] %s1599_s24 }
  0x27   : > { %301 = vxpose.xlu0.b32.start [1/16] %v173_v2, 128  ;;  %v181_v5 = vld [vmem:[%s2051_s15 + $0x40] sm:$0xff]  ;;  %v191_v6 = vld [vmem:[%s2051_s15 + $0x90] sm:$0xff]  ;;  %v190_v7 = vld [vmem:[%s2051_s15 + $0x88] sm:$0xff]  ;;  %s1601_s25 = sshll.u32 %s1598_s23, 4  ;;  %s1582_s26 = scalar_lea.sflag [#allocation5], %s2045_s5  ;;  %s1602_s25 = int_to_ptr.hbm [resolvable:$true] %s1601_s25 }
  0x28   : > { %v189_v8 = vld [vmem:[%s2051_s15 + $0x80] sm:$0xff]  ;;  %v199_v9 = vld [vmem:[%s2051_s15 + $0xd0] sm:$0xff]  ;;  %v198_v10 = vld [vmem:[%s2051_s15 + $0xc8] sm:$0xff]  ;;  %s1887_s27 = sshra.s32 %s1602_s25, 4  ;;  %s1893_s30 = scalar_lea.hbm %s3061_s1, 2048  ;;  %s1888_s27 = int_to_ptr.hbm [resolvable:$true] %s1887_s27 }
  0x29   : > { %v197_v11 = vld [vmem:[%s2051_s15 + $0xc0] sm:$0xff]  ;;  %v207_v12 = vld [vmem:[%s2051_s15 + $0x110] sm:$0xff]  ;;  %v206_v13 = vld [vmem:[%s2051_s15 + $0x108] sm:$0xff]  ;;  %s1889_s28 = scalar_lea.hbm %s1888_s27, 1024  ;;  %p1894_p7 = scmp.lt.s32.totalorder %s1888_s27, %s3061_s1 }
  0x2a   : > { %v205_v14 = vld [vmem:[%s2051_s15 + $0x100] sm:$0xff]  ;;  %v215_v15 = vld [vmem:[%s2051_s15 + $0x150] sm:$0xff]  ;;  %v214_v16 = vld [vmem:[%s2051_s15 + $0x148] sm:$0xff]  ;;  %p1890_p4 = scmp.ne.s32.totalorder %s1888_s27, %s1889_s28  ;;  %p1895_p8 = scmp.lt.s32.totalorder %s1893_s30, %s1889_s28 }
  0x2b   : > { %v213_v17 = vld [vmem:[%s2051_s15 + $0x140] sm:$0xff]  ;;  %v223_v18 = vld [vmem:[%s2051_s15 + $0x190] sm:$0xff]  ;;  %v222_v19 = vld [vmem:[%s2051_s15 + $0x188] sm:$0xff] }
  0x2c   : > { %v221_v20 = vld [vmem:[%s2051_s15 + $0x180] sm:$0xff]  ;;  %v231_v21 = vld [vmem:[%s2051_s15 + $0x1d0] sm:$0xff]  ;;  %v230_v22 = vld [vmem:[%s2051_s15 + $0x1c8] sm:$0xff]  ;;  %p1891_p5 = pnand %p1890_p4, %p2022_p9  ;;  %p1896_p10 = por %p1895_p8, %p1894_p7 }
  0x2d   : > { %v229_v23 = vld [vmem:[%s2051_s15 + $0x1c0] sm:$0xff]  ;;  %v239_v24 = vld [vmem:[%s2051_s15 + $0x210] sm:$0xff]  ;;  %v238_v25 = vld [vmem:[%s2051_s15 + $0x208] sm:$0xff] }
  0x2e   : > { %366 = vxpose.xlu2.b32.cont [2/16] %v183_v3, 128  ;;  %334 = vxpose.xlu1.b32.cont [2/16] %v182_v4, 128  ;;  %v237_v26 = vld [vmem:[%s2051_s15 + $0x200] sm:$0xff]  ;;  %v247_v27 = vld [vmem:[%s2051_s15 + $0x250] sm:$0xff]  ;;  %v246_v28 = vld [vmem:[%s2051_s15 + $0x248] sm:$0xff]  ;;  %p1892_p6 = pneg %p1891_p5 }
  0x2f   : > { %302 = vxpose.xlu0.b32.cont [2/16] %v181_v5, 128  ;;  %v245_v29 = vld [vmem:[%s2051_s15 + $0x240] sm:$0xff]  ;;  %v255_v30 = vld [vmem:[%s2051_s15 + $0x290] sm:$0xff]  ;;  %v254_v31 = vld [vmem:[%s2051_s15 + $0x288] sm:$0xff] }
  0x30   : > { %v253_v32 = vld [vmem:[%s2051_s15 + $0x280] sm:$0xff]  ;;  %v263_v33 = vld [vmem:[%s2051_s15 + $0x2d0] sm:$0xff]  ;;  %v262_v34 = vld [vmem:[%s2051_s15 + $0x2c8] sm:$0xff]  ;;  %p1897_p13 = pnand %p1896_p10, %p1892_p6 }
  0x31   : > { %v261_v35 = vld [vmem:[%s2051_s15 + $0x2c0] sm:$0xff]  ;;  %v271_v36 = vld [vmem:[%s2051_s15 + $0x310] sm:$0xff]  ;;  %v270_v37 = vld [vmem:[%s2051_s15 + $0x308] sm:$0xff] }
  0x32   : > { %v269_v38 = vld [vmem:[%s2051_s15 + $0x300] sm:$0xff]  ;;  %v279_v39 = vld [vmem:[%s2051_s15 + $0x350] sm:$0xff]  ;;  %v278_v40 = vld [vmem:[%s2051_s15 + $0x348] sm:$0xff] }
  0x33   : > { %v277_v41 = vld [vmem:[%s2051_s15 + $0x340] sm:$0xff]  ;;  %v287_v42 = vld [vmem:[%s2051_s15 + $0x390] sm:$0xff]  ;;  %v286_v43 = vld [vmem:[%s2051_s15 + $0x388] sm:$0xff] }
  0x34   : > { %v285_v44 = vld [vmem:[%s2051_s15 + $0x380] sm:$0xff]  ;;  %v295_v45 = vld [vmem:[%s2051_s15 + $0x3d0] sm:$0xff]  ;;  %v294_v46 = vld [vmem:[%s2051_s15 + $0x3c8] sm:$0xff] }
  0x35   : > { %v293_v47 = vld [vmem:[%s2051_s15 + $0x3c0] sm:$0xff]  ;;  %v178_v48 = vld [vmem:[%s2051_s15 + $0x28] sm:$0xff]  ;;  %v176_v50 = vld [vmem:[%s2051_s15 + $0x18] sm:$0xff] }
  0x36   : > { %367 = vxpose.xlu2.b32.cont [3/16] %v191_v6, 128  ;;  %335 = vxpose.xlu1.b32.cont [3/16] %v190_v7, 128  ;;  %v177_v49 = vld [vmem:[%s2051_s15 + $0x20] sm:$0xff]  ;;  %v186_v51 = vld [vmem:[%s2051_s15 + $0x68] sm:$0xff]  ;;  %v184_v53 = vld [vmem:[%s2051_s15 + $0x58] sm:$0xff] }
  0x37   : > { %303 = vxpose.xlu0.b32.cont [3/16] %v189_v8, 128  ;;  %v185_v52 = vld [vmem:[%s2051_s15 + $0x60] sm:$0xff]  ;;  %v194_v54 = vld [vmem:[%s2051_s15 + $0xa8] sm:$0xff]  ;;  %v192_v56 = vld [vmem:[%s2051_s15 + $0x98] sm:$0xff] }
  0x38   : > { %v193_v55 = vld [vmem:[%s2051_s15 + $0xa0] sm:$0xff]  ;;  %v202_v57 = vld [vmem:[%s2051_s15 + $0xe8] sm:$0xff]  ;;  %v200_v59 = vld [vmem:[%s2051_s15 + $0xd8] sm:$0xff] }
  0x39   : > { %v201_v58 = vld [vmem:[%s2051_s15 + $0xe0] sm:$0xff]  ;;  %v210_v60 = vld [vmem:[%s2051_s15 + $0x128] sm:$0xff]  ;;  %v208_v62 = vld [vmem:[%s2051_s15 + $0x118] sm:$0xff] }
  0x3a   : > { %v209_v61 = vld [vmem:[%s2051_s15 + $0x120] sm:$0xff]  ;;  %v218_v1 = vld [vmem:[%s2051_s15 + $0x168] sm:$0xff]  ;;  %v216_v3 = vld [vmem:[%s2051_s15 + $0x158] sm:$0xff] }
  0x3b   : > { %v217_v2 = vld [vmem:[%s2051_s15 + $0x160] sm:$0xff]  ;;  %v226_v6 = vld [vmem:[%s2051_s15 + $0x1a8] sm:$0xff]  ;;  %v224_v8 = vld [vmem:[%s2051_s15 + $0x198] sm:$0xff] }
  0x3c   : > { %v225_v7 = vld [vmem:[%s2051_s15 + $0x1a0] sm:$0xff] }
  0x3e   : > { %368 = vxpose.xlu2.b32.cont [4/16] %v199_v9, 128  ;;  %336 = vxpose.xlu1.b32.cont [4/16] %v198_v10, 128  ;;  %v234_v9 = vld [vmem:[%s2051_s15 + $0x1e8] sm:$0xff] }
  0x3f   : > { %304 = vxpose.xlu0.b32.cont [4/16] %v197_v11, 128 }
  0x46   : > { %369 = vxpose.xlu2.b32.cont [5/16] %v207_v12, 128  ;;  %337 = vxpose.xlu1.b32.cont [5/16] %v206_v13, 128  ;;  %v233_v12 = vld [vmem:[%s2051_s15 + $0x1e0] sm:$0xff] }
  0x47   : > { %305 = vxpose.xlu0.b32.cont [5/16] %v205_v14, 128 }
  0x4e   : > { %370 = vxpose.xlu2.b32.cont [6/16] %v215_v15, 128  ;;  %338 = vxpose.xlu1.b32.cont [6/16] %v214_v16, 128  ;;  %v232_v15 = vld [vmem:[%s2051_s15 + $0x1d8] sm:$0xff] }
  0x4f   : > { %306 = vxpose.xlu0.b32.cont [6/16] %v213_v17, 128 }
  0x56   : > { %371 = vxpose.xlu2.b32.cont [7/16] %v223_v18, 128  ;;  %339 = vxpose.xlu1.b32.cont [7/16] %v222_v19, 128  ;;  %v242_v19 = vld [vmem:[%s2051_s15 + $0x228] sm:$0xff] }
  0x57   : > { %307 = vxpose.xlu0.b32.cont [7/16] %v221_v20, 128  ;;  %v241_v20 = vld [vmem:[%s2051_s15 + $0x220] sm:$0xff] }
  0x5e   : > { %372 = vxpose.xlu2.b32.cont [8/16] %v231_v21, 128  ;;  %340 = vxpose.xlu1.b32.cont [8/16] %v230_v22, 128  ;;  %v240_v21 = vld [vmem:[%s2051_s15 + $0x218] sm:$0xff]  ;;  %v250_v22 = vld [vmem:[%s2051_s15 + $0x268] sm:$0xff] }
  0x5f   : > { %308 = vxpose.xlu0.b32.cont [8/16] %v229_v23, 128 }
  0x66   : > { %373 = vxpose.xlu2.b32.cont [9/16] %v239_v24, 128  ;;  %341 = vxpose.xlu1.b32.cont [9/16] %v238_v25, 128  ;;  %v249_v25 = vld [vmem:[%s2051_s15 + $0x260] sm:$0xff] }
  0x67   : > { %309 = vxpose.xlu0.b32.cont [9/16] %v237_v26, 128 }
  0x6e   : > { %374 = vxpose.xlu2.b32.cont [10/16] %v247_v27, 128  ;;  %342 = vxpose.xlu1.b32.cont [10/16] %v246_v28, 128  ;;  %v248_v28 = vld [vmem:[%s2051_s15 + $0x258] sm:$0xff] }
  0x6f   : > { %310 = vxpose.xlu0.b32.cont [10/16] %v245_v29, 128  ;;  %v284_v29 = vld [vmem:[%s2051_s15 + $0x378] sm:$0xff] }
  0x76   : > { %375 = vxpose.xlu2.b32.cont [11/16] %v255_v30, 128  ;;  %343 = vxpose.xlu1.b32.cont [11/16] %v254_v31, 128 }
  0x77   : > { %311 = vxpose.xlu0.b32.cont [11/16] %v253_v32, 128  ;;  %v258_v32 = vld [vmem:[%s2051_s15 + $0x2a8] sm:$0xff] }
  0x7e   : > { %376 = vxpose.xlu2.b32.cont [12/16] %v263_v33, 128  ;;  %344 = vxpose.xlu1.b32.cont [12/16] %v262_v34, 128  ;;  %v257_v33 = vld [vmem:[%s2051_s15 + $0x2a0] sm:$0xff]  ;;  %v256_v34 = vld [vmem:[%s2051_s15 + $0x298] sm:$0xff] }
  0x7f   : > { %312 = vxpose.xlu0.b32.cont [12/16] %v261_v35, 128 }
  0x86   : > { %377 = vxpose.xlu2.b32.cont [13/16] %v271_v36, 128  ;;  %345 = vxpose.xlu1.b32.cont [13/16] %v270_v37, 128  ;;  %v266_v36 = vld [vmem:[%s2051_s15 + $0x2e8] sm:$0xff] }
  0x87   : > { %313 = vxpose.xlu0.b32.cont [13/16] %v269_v38, 128 }
  0x8e   : > { %378 = vxpose.xlu2.b32.cont [14/16] %v279_v39, 128  ;;  %346 = vxpose.xlu1.b32.cont [14/16] %v278_v40, 128  ;;  %v265_v39 = vld [vmem:[%s2051_s15 + $0x2e0] sm:$0xff] }
  0x8f   : > { %314 = vxpose.xlu0.b32.cont [14/16] %v277_v41, 128 }
  0x96   : > { %379 = vxpose.xlu2.b32.cont [15/16] %v287_v42, 128  ;;  %347 = vxpose.xlu1.b32.cont [15/16] %v286_v43, 128  ;;  %v264_v42 = vld [vmem:[%s2051_s15 + $0x2d8] sm:$0xff] }
  0x97   : > { %315 = vxpose.xlu0.b32.cont [15/16] %v285_v44, 128 }
  0x9e   : > { %380 = vxpose.xlu2.b32.end [16/16] %v295_v45, 128  ;;  %348 = vxpose.xlu1.b32.end [16/16] %v294_v46, 128 }
  0x9f   : > { %316 = vxpose.xlu0.b32.end [16/16] %v293_v47, 128  ;;  %v274_v47 = vld [vmem:[%s2051_s15 + $0x328] sm:$0xff] }
  0xa6   : > { %461 = vxpose.xlu2.b32.start [1/16] %v178_v48, 128  ;;  %429 = vxpose.xlu1.b32.start [1/16] %v177_v49, 128  ;;  %v273_v48 = vld [vmem:[%s2051_s15 + $0x320] sm:$0xff]  ;;  %v272_v49 = vld [vmem:[%s2051_s15 + $0x318] sm:$0xff] }
  0xa7   : > { %397 = vxpose.xlu0.b32.start [1/16] %v176_v50, 128 }
  0xae   : > { %462 = vxpose.xlu2.b32.cont [2/16] %v186_v51, 128  ;;  %430 = vxpose.xlu1.b32.cont [2/16] %v185_v52, 128  ;;  %v282_v51 = vld [vmem:[%s2051_s15 + $0x368] sm:$0xff] }
  0xaf   : > { %398 = vxpose.xlu0.b32.cont [2/16] %v184_v53, 128 }
  0xb6   : > { %463 = vxpose.xlu2.b32.cont [3/16] %v194_v54, 128  ;;  %431 = vxpose.xlu1.b32.cont [3/16] %v193_v55, 128  ;;  %v281_v54 = vld [vmem:[%s2051_s15 + $0x360] sm:$0xff] }
  0xb7   : > { %399 = vxpose.xlu0.b32.cont [3/16] %v192_v56, 128 }
  0xbe   : > { %464 = vxpose.xlu2.b32.cont [4/16] %v202_v57, 128  ;;  %432 = vxpose.xlu1.b32.cont [4/16] %v201_v58, 128  ;;  %v280_v57 = vld [vmem:[%s2051_s15 + $0x358] sm:$0xff] }
  0xbf   : > { %400 = vxpose.xlu0.b32.cont [4/16] %v200_v59, 128  ;;  %v381_v35 = vpop.trf.xlu2 }
  0xc0   : > { %589 = vst [vmem:[#allocation2 + $0x100] sm:$0xff] %v381_v35 }
  0xc6   : > { %465 = vxpose.xlu2.b32.cont [5/16] %v210_v60, 128  ;;  %433 = vxpose.xlu1.b32.cont [5/16] %v209_v61, 128 }
  0xc7   : > { %401 = vxpose.xlu0.b32.cont [5/16] %v208_v62, 128  ;;  %v382_v44 = vpop.trf.xlu2 }
  0xc8   : > { %590 = vst [vmem:[#allocation2 + $0x108] sm:$0xff] %v382_v44 }
  0xca   : > { %v349_v63 = vpop.trf.xlu1 }
  0xcb   : > { %v317_v0 = vpop.trf.xlu0  ;;  %573 = vst [vmem:[#allocation2 + $0x80] sm:$0xff] %v349_v63 }
  0xcc   : > { %557 = vst [vmem:[#allocation2] sm:$0xff] %v317_v0 }
  0xce   : > { %466 = vxpose.xlu2.b32.cont [6/16] %v218_v1, 128  ;;  %434 = vxpose.xlu1.b32.cont [6/16] %v217_v2, 128  ;;  %v290_v1 = vld [vmem:[%s2051_s15 + $0x3a8] sm:$0xff]  ;;  %v289_v2 = vld [vmem:[%s2051_s15 + $0x3a0] sm:$0xff] }
  0xcf   : > { %402 = vxpose.xlu0.b32.cont [6/16] %v216_v3, 128  ;;  %v383_v50 = vpop.trf.xlu2  ;;  %v288_v3 = vld [vmem:[%s2051_s15 + $0x398] sm:$0xff] }
  0xd0   : > { %591 = vst [vmem:[#allocation2 + $0x110] sm:$0xff] %v383_v50  ;;  %v2218_v50 = vld [vmem:[#allocation2 + $0x100] ss:$2 sm:$0xff] }
  0xd2   : > { %v350_v4 = vpop.trf.xlu1 }
  0xd3   : > { %v318_v5 = vpop.trf.xlu0  ;;  %574 = vst [vmem:[#allocation2 + $0x88] sm:$0xff] %v350_v4 }
  0xd4   : > { %558 = vst [vmem:[#allocation2 + $0x8] sm:$0xff] %v318_v5  ;;  %v298_v5 = vld [vmem:[%s2051_s15 + $0x3e8] sm:$0xff] }
  0xd6   : > { %467 = vxpose.xlu2.b32.cont [7/16] %v226_v6, 128  ;;  %435 = vxpose.xlu1.b32.cont [7/16] %v225_v7, 128 }
  0xd7   : > { %403 = vxpose.xlu0.b32.cont [7/16] %v224_v8, 128  ;;  %v384_v62 = vpop.trf.xlu2  ;;  %v297_v8 = vld [vmem:[%s2051_s15 + $0x3e0] sm:$0xff] }
  0xd8   : > { %592 = vst [vmem:[#allocation2 + $0x118] sm:$0xff] %v384_v62 }
  0xda   : > { %v351_v10 = vpop.trf.xlu1  ;;  %v2171_v59 = vld [vmem:[#allocation2 + $0x80] ss:$2 sm:$0xff]  ;;  %v2173_v60 = vld [vmem:[#allocation2 + $0x81] ss:$2 sm:$0xff] }
  0xdb   : > { %v319_v11 = vpop.trf.xlu0  ;;  %575 = vst [vmem:[#allocation2 + $0x90] sm:$0xff] %v351_v10  ;;  %v2128_v13 = vld [vmem:[#allocation2] ss:$2 sm:$0xff]  ;;  %v2130_v14 = vld [vmem:[#allocation2 + $0x1] ss:$2 sm:$0xff] }
  0xdc   : > { %559 = vst [vmem:[#allocation2 + $0x10] sm:$0xff] %v319_v11  ;;  %v296_v11 = vld [vmem:[%s2051_s15 + $0x3d8] sm:$0xff] }
  0xdd   : > { %3122 = vst [vmem:[#allocation9_spill] sm:$0xff] %v2171_v59 }
  0xde   : > { %468 = vxpose.xlu2.b32.cont [8/16] %v234_v9, 128  ;;  %436 = vxpose.xlu1.b32.cont [8/16] %v233_v12, 128  ;;  %3123 = vst [vmem:[#allocation10_spill] sm:$0xff] %v2173_v60 }
  0xdf   : > { %404 = vxpose.xlu0.b32.cont [8/16] %v232_v15, 128  ;;  %v385_v4 = vpop.trf.xlu2 }
  0xe0   : > { %593 = vst [vmem:[#allocation2 + $0x120] sm:$0xff] %v385_v4  ;;  %v203_v4 = vld [vmem:[%s2051_s15 + $0xf0] sm:$0xff] }
  0xe2   : > { %v352_v17 = vpop.trf.xlu1 }
  0xe3   : > { %v320_v18 = vpop.trf.xlu0  ;;  %576 = vst [vmem:[#allocation2 + $0x98] sm:$0xff] %v352_v17 }
  0xe4   : > { %560 = vst [vmem:[#allocation2 + $0x18] sm:$0xff] %v320_v18 }
  0xe6   : > { %469 = vxpose.xlu2.b32.cont [9/16] %v242_v19, 128  ;;  %437 = vxpose.xlu1.b32.cont [9/16] %v241_v20, 128  ;;  %v940_v20 = vadd.f32 %v2130_v14, %v2128_v13 }
  0xe7   : > { %405 = vxpose.xlu0.b32.cont [9/16] %v240_v21, 128  ;;  %v386_v19 = vpop.trf.xlu2 }
  0xe8   : > { %594 = vst [vmem:[#allocation2 + $0x128] sm:$0xff] %v386_v19 }
  0xea   : > { %v353_v23 = vpop.trf.xlu1  ;;  %v2189_v15 = vld [vmem:[#allocation2 + $0x90] ss:$2 sm:$0xff]  ;;  %v2191_v17 = vld [vmem:[#allocation2 + $0x91] ss:$2 sm:$0xff] }
  0xeb   : > { %v321_v24 = vpop.trf.xlu0  ;;  %577 = vst [vmem:[#allocation2 + $0xa0] sm:$0xff] %v353_v23  ;;  %v2140_v26 = vld [vmem:[#allocation2 + $0x10] ss:$2 sm:$0xff]  ;;  %v2142_v27 = vld [vmem:[#allocation2 + $0x11] ss:$2 sm:$0xff] }
  0xec   : > { %561 = vst [vmem:[#allocation2 + $0x20] sm:$0xff] %v321_v24  ;;  %v180_v23 = vld [vmem:[%s2051_s15 + $0x38] sm:$0xff]  ;;  %v179_v24 = vld [vmem:[%s2051_s15 + $0x30] sm:$0xff] }
  0xed   : > { %3124 = vst [vmem:[#allocation11_spill] sm:$0xff] %v2189_v15 }
  0xee   : > { %470 = vxpose.xlu2.b32.cont [10/16] %v250_v22, 128  ;;  %438 = vxpose.xlu1.b32.cont [10/16] %v249_v25, 128  ;;  %3125 = vst [vmem:[#allocation12_spill] sm:$0xff] %v2191_v17  ;;  %v1068_v25 = vmul.f32 0.35355338, %v940_v20 }
  0xef   : > { %406 = vxpose.xlu0.b32.cont [10/16] %v248_v28, 128  ;;  %v387_v28 = vpop.trf.xlu2 }
  0xf0   : > { %595 = vst [vmem:[#allocation2 + $0x130] sm:$0xff] %v387_v28  ;;  %v211_v28 = vld [vmem:[%s2051_s15 + $0x130] sm:$0xff] }
  0xf2   : > { %v354_v30 = vpop.trf.xlu1 }
  0xf3   : > { %v322_v31 = vpop.trf.xlu0  ;;  %578 = vst [vmem:[#allocation2 + $0xa8] sm:$0xff] %v354_v30  ;;  %v941_v30 = vadd.f32 %v2142_v27, %v2140_v26 }
  0xf4   : > { %562 = vst [vmem:[#allocation2 + $0x28] sm:$0xff] %v322_v31 }
  0xf6   : > { %471 = vxpose.xlu2.b32.cont [11/16] %v258_v32, 128  ;;  %439 = vxpose.xlu1.b32.cont [11/16] %v257_v33, 128  ;;  %v188_v33 = vld [vmem:[%s2051_s15 + $0x78] sm:$0xff] }
  0xf7   : > { %407 = vxpose.xlu0.b32.cont [11/16] %v256_v34, 128 }
  0xfa   : > { %v355_v37 = vpop.trf.xlu1 }
  0xfb   : > { %v323_v38 = vpop.trf.xlu0  ;;  %579 = vst [vmem:[#allocation2 + $0xb0] sm:$0xff] %v355_v37  ;;  %v2152_v40 = vld [vmem:[#allocation2 + $0x20] ss:$2 sm:$0xff]  ;;  %v2154_v41 = vld [vmem:[#allocation2 + $0x21] ss:$2 sm:$0xff] }
  0xfc   : > { %563 = vst [vmem:[#allocation2 + $0x30] sm:$0xff] %v323_v38  ;;  %v1069_v37 = vmul.f32 0.35355338, %v941_v30  ;;  %v268_v38 = vld [vmem:[%s2051_s15 + $0x2f8] sm:$0xff] }
  0xfe   : > { %472 = vxpose.xlu2.b32.cont [12/16] %v266_v36, 128  ;;  %440 = vxpose.xlu1.b32.cont [12/16] %v265_v39, 128  ;;  %v187_v36 = vld [vmem:[%s2051_s15 + $0x70] sm:$0xff]  ;;  %v2209_v39 = vld [vmem:[#allocation2 + $0xa0] ss:$2 sm:$0xff] }
  0xff   : > { %408 = vxpose.xlu0.b32.cont [12/16] %v264_v42, 128  ;;  %3128 = vst [vmem:[#allocation15_spill] sm:$0xff] %v2209_v39  ;;  %v2211_v42 = vld [vmem:[#allocation2 + $0xa1] ss:$2 sm:$0xff] }
 0x100   : > { %3129 = vst [vmem:[#allocation16_spill] sm:$0xff] %v2211_v42 }
 0x102   : > { %v356_v45 = vpop.trf.xlu1 }
 0x103   : > { %v324_v46 = vpop.trf.xlu0  ;;  %580 = vst [vmem:[#allocation2 + $0xb8] sm:$0xff] %v356_v45  ;;  %v388_v45 = vpop.trf.xlu2 }
 0x104   : > { %564 = vst [vmem:[#allocation2 + $0x38] sm:$0xff] %v324_v46  ;;  %v942_v46 = vadd.f32 %v2154_v41, %v2152_v40 }
 0x105   : > { %596 = vst [vmem:[#allocation2 + $0x138] sm:$0xff] %v388_v45  ;;  %v220_v45 = vld [vmem:[%s2051_s15 + $0x178] sm:$0xff] }
 0x106   : > { %473 = vxpose.xlu2.b32.cont [13/16] %v274_v47, 128  ;;  %441 = vxpose.xlu1.b32.cont [13/16] %v273_v48, 128 }
 0x107   : > { %409 = vxpose.xlu0.b32.cont [13/16] %v272_v49, 128  ;;  %v196_v49 = vld [vmem:[%s2051_s15 + $0xb8] sm:$0xff] }
 0x10a   : > { %v357_v52 = vpop.trf.xlu1 }
 0x10b   : > { %v325_v53 = vpop.trf.xlu0  ;;  %581 = vst [vmem:[#allocation2 + $0xc0] sm:$0xff] %v357_v52  ;;  %v2164_v55 = vld [vmem:[#allocation2 + $0x30] ss:$2 sm:$0xff]  ;;  %v2166_v56 = vld [vmem:[#allocation2 + $0x31] ss:$2 sm:$0xff] }
 0x10c   : > { %565 = vst [vmem:[#allocation2 + $0x40] sm:$0xff] %v325_v53  ;;  %v195_v52 = vld [vmem:[%s2051_s15 + $0xb0] sm:$0xff]  ;;  %v1070_v53 = vmul.f32 0.35355338, %v942_v46  ;;  %v943_v62 = vadd.f32 %v2166_v56, %v2164_v55 }
 0x10e   : > { %474 = vxpose.xlu2.b32.cont [14/16] %v282_v51, 128  ;;  %442 = vxpose.xlu1.b32.cont [14/16] %v281_v54, 128  ;;  %v2220_v51 = vld [vmem:[#allocation2 + $0x101] ss:$2 sm:$0xff]  ;;  %v292_v54 = vld [vmem:[%s2051_s15 + $0x3b8] sm:$0xff] }
 0x10f   : > { %410 = vxpose.xlu0.b32.cont [14/16] %v280_v57, 128  ;;  %v389_v57 = vpop.trf.xlu2 }
 0x110   : > { %597 = vst [vmem:[#allocation2 + $0x140] sm:$0xff] %v389_v57 }
 0x112   : > { %v358_v63 = vpop.trf.xlu1 }
 0x113   : > { %v326_v0 = vpop.trf.xlu0  ;;  %582 = vst [vmem:[#allocation2 + $0xc8] sm:$0xff] %v358_v63 }
 0x114   : > { %566 = vst [vmem:[#allocation2 + $0x48] sm:$0xff] %v326_v0 }
 0x116   : > { %475 = vxpose.xlu2.b32.cont [15/16] %v290_v1, 128  ;;  %443 = vxpose.xlu1.b32.cont [15/16] %v289_v2, 128  ;;  %v204_v1 = vld [vmem:[%s2051_s15 + $0xf8] sm:$0xff] }
 0x117   : > { %411 = vxpose.xlu0.b32.cont [15/16] %v288_v3, 128  ;;  %v390_v19 = vpop.trf.xlu2 }
 0x118   : > { %598 = vst [vmem:[#allocation2 + $0x148] sm:$0xff] %v390_v19  ;;  %v2270_v19 = vld [vmem:[#allocation2 + $0x120] ss:$2 sm:$0xff] }
 0x11a   : > { %v359_v6 = vpop.trf.xlu1  ;;  %v2263_v57 = vld [vmem:[#allocation2 + $0xc1] ss:$2 sm:$0xff] }
 0x11b   : > { %v327_v7 = vpop.trf.xlu0  ;;  %583 = vst [vmem:[#allocation2 + $0xd0] sm:$0xff] %v359_v6  ;;  %v2182_v9 = vld [vmem:[#allocation2 + $0x40] ss:$2 sm:$0xff]  ;;  %v2184_v10 = vld [vmem:[#allocation2 + $0x41] ss:$2 sm:$0xff] }
 0x11c   : > { %567 = vst [vmem:[#allocation2 + $0x50] sm:$0xff] %v327_v7  ;;  %v2235_v7 = vld [vmem:[#allocation2 + $0xb0] ss:$2 sm:$0xff]  ;;  %v944_v20 = vadd.f32 %v2184_v10, %v2182_v9 }
 0x11d   : > { %3132 = vst [vmem:[#allocation19_spill] sm:$0xff] %v2235_v7 }
 0x11e   : > { %476 = vxpose.xlu2.b32.end [16/16] %v298_v5, 128  ;;  %444 = vxpose.xlu1.b32.end [16/16] %v297_v8, 128  ;;  %v1071_v5 = vmul.f32 0.35355338, %v943_v62  ;;  %v2237_v8 = vld [vmem:[#allocation2 + $0xb1] ss:$2 sm:$0xff]  ;;  %v1072_v30 = vmul.f32 0.35355338, %v944_v20 }
 0x11f   : > { %412 = vxpose.xlu0.b32.end [16/16] %v296_v11, 128  ;;  %3133 = vst [vmem:[#allocation20_spill] sm:$0xff] %v2237_v8  ;;  %v2272_v20 = vld [vmem:[#allocation2 + $0x121] ss:$2 sm:$0xff]  ;;  %v252_v11 = vld [vmem:[%s2051_s15 + $0x278] sm:$0xff] }
 0x120   : > { %3137 = vst [vmem:[#allocation24_spill] sm:$0xff] %v2263_v57 }
 0x122   : > { %v360_v21 = vpop.trf.xlu1 }
 0x123   : > { %v328_v22 = vpop.trf.xlu0  ;;  %584 = vst [vmem:[#allocation2 + $0xd8] sm:$0xff] %v360_v21 }
 0x124   : > { %568 = vst [vmem:[#allocation2 + $0x58] sm:$0xff] %v328_v22 }
 0x126   : > { %525 = vxpose.xlu1.b32.start [1/16] %v180_v23, 128  ;;  %1132 = vxpose.xlu2.b32.start [1/16] %v1068_v25, 128  ;;  %v212_v23 = vld [vmem:[%s2051_s15 + $0x138] sm:$0xff] }
 0x127   : > { %493 = vxpose.xlu0.b32.start [1/16] %v179_v24, 128  ;;  %v2244_v24 = vld [vmem:[#allocation2 + $0x110] ss:$2 sm:$0xff]  ;;  %v2246_v25 = vld [vmem:[#allocation2 + $0x111] ss:$2 sm:$0xff] }
 0x12a   : > { %v361_v31 = vpop.trf.xlu1 }
 0x12b   : > { %v329_v32 = vpop.trf.xlu0  ;;  %585 = vst [vmem:[#allocation2 + $0xe0] sm:$0xff] %v361_v31  ;;  %v2202_v34 = vld [vmem:[#allocation2 + $0x50] ss:$2 sm:$0xff]  ;;  %v2204_v35 = vld [vmem:[#allocation2 + $0x51] ss:$2 sm:$0xff] }
 0x12c   : > { %3126 = vst [vmem:[#allocation13_spill] sm:$0xff] %v2202_v34 }
 0x12d   : > { %3127 = vst [vmem:[#allocation14_spill] sm:$0xff] %v2204_v35 }
 0x12e   : > { %569 = vst [vmem:[#allocation2 + $0x60] sm:$0xff] %v329_v32  ;;  %526 = vxpose.xlu1.b32.cont [2/16] %v188_v33, 128  ;;  %1133 = vxpose.xlu2.b32.cont [2/16] %v1069_v37, 128  ;;  %v391_v32 = vpop.trf.xlu2  ;;  %v945_v33 = vadd.f32 %v2204_v35, %v2202_v34 }
 0x12f   : > { %494 = vxpose.xlu0.b32.cont [2/16] %v187_v36, 128  ;;  %599 = vst [vmem:[#allocation2 + $0x150] sm:$0xff] %v391_v32 }
 0x132   : > { %v362_v47 = vpop.trf.xlu1 }
 0x133   : > { %v330_v48 = vpop.trf.xlu0  ;;  %586 = vst [vmem:[#allocation2 + $0xe8] sm:$0xff] %v362_v47 }
 0x134   : > { %570 = vst [vmem:[#allocation2 + $0x68] sm:$0xff] %v330_v48  ;;  %v219_v48 = vld [vmem:[%s2051_s15 + $0x170] sm:$0xff] }
 0x136   : > { %527 = vxpose.xlu1.b32.cont [3/16] %v196_v49, 128  ;;  %1134 = vxpose.xlu2.b32.cont [3/16] %v1070_v53, 128  ;;  %v1073_v49 = vmul.f32 0.35355338, %v945_v33  ;;  %v2261_v53 = vld [vmem:[#allocation2 + $0xc0] ss:$2 sm:$0xff] }
 0x137   : > { %495 = vxpose.xlu0.b32.cont [3/16] %v195_v52, 128  ;;  %3136 = vst [vmem:[#allocation23_spill] sm:$0xff] %v2261_v53  ;;  %v2324_v52 = vld [vmem:[#allocation2 + $0x141] ss:$2 sm:$0xff] }
 0x13a   : > { %v363_v63 = vpop.trf.xlu1 }
 0x13b   : > { %v331_v0 = vpop.trf.xlu0  ;;  %587 = vst [vmem:[#allocation2 + $0xf0] sm:$0xff] %v363_v63  ;;  %v2228_v2 = vld [vmem:[#allocation2 + $0x60] ss:$2 sm:$0xff]  ;;  %v2230_v3 = vld [vmem:[#allocation2 + $0x61] ss:$2 sm:$0xff]  ;;  %v392_v63 = vpop.trf.xlu2 }
 0x13c   : > { %3130 = vst [vmem:[#allocation17_spill] sm:$0xff] %v2228_v2 }
 0x13d   : > { %3131 = vst [vmem:[#allocation18_spill] sm:$0xff] %v2230_v3 }
 0x13e   : > { %571 = vst [vmem:[#allocation2 + $0x70] sm:$0xff] %v331_v0  ;;  %528 = vxpose.xlu1.b32.cont [4/16] %v204_v1, 128  ;;  %1135 = vxpose.xlu2.b32.cont [4/16] %v1071_v5, 128  ;;  %v946_v0 = vadd.f32 %v2230_v3, %v2228_v2  ;;  %v228_v5 = vld [vmem:[%s2051_s15 + $0x1b8] sm:$0xff] }
 0x13f   : > { %496 = vxpose.xlu0.b32.cont [4/16] %v203_v4, 128  ;;  %600 = vst [vmem:[#allocation2 + $0x158] sm:$0xff] %v392_v63  ;;  %v260_v63 = vld [vmem:[%s2051_s15 + $0x2b8] sm:$0xff] }
 0x142   : > { %v364_v21 = vpop.trf.xlu1 }
 0x143   : > { %v332_v22 = vpop.trf.xlu0  ;;  %588 = vst [vmem:[#allocation2 + $0xf8] sm:$0xff] %v364_v21  ;;  %v227_v21 = vld [vmem:[%s2051_s15 + $0x1b0] sm:$0xff] }
 0x144   : > { %572 = vst [vmem:[#allocation2 + $0x78] sm:$0xff] %v332_v22  ;;  %v1074_v22 = vmul.f32 0.35355338, %v946_v0  ;;  %v2287_v0 = vld [vmem:[#allocation2 + $0xd0] ss:$2 sm:$0xff] }
 0x145   : > { %3138 = vst [vmem:[#allocation25_spill] sm:$0xff] %v2287_v0 }
 0x146   : > { %529 = vxpose.xlu1.b32.cont [5/16] %v212_v23, 128  ;;  %1136 = vxpose.xlu2.b32.cont [5/16] %v1072_v30, 128  ;;  %v2350_v43 = vld [vmem:[#allocation2 + $0x151] ss:$2 sm:$0xff] }
 0x147   : > { %497 = vxpose.xlu0.b32.cont [5/16] %v211_v28, 128  ;;  %v393_v28 = vpop.trf.xlu2 }
 0x148   : > { %601 = vst [vmem:[#allocation2 + $0x160] sm:$0xff] %v393_v28 }
 0x14a   : > { %v445_v36 = vpop.trf.xlu1 }
 0x14b   : > { %v413_v37 = vpop.trf.xlu0  ;;  %621 = vst [vmem:[#allocation2 + $0x200] sm:$0xff] %v445_v36  ;;  %v2254_v46 = vld [vmem:[#allocation2 + $0x70] ss:$2 sm:$0xff]  ;;  %v2256_v47 = vld [vmem:[#allocation2 + $0x71] ss:$2 sm:$0xff] }
 0x14c   : > { %3134 = vst [vmem:[#allocation21_spill] sm:$0xff] %v2254_v46  ;;  %v947_v30 = vadd.f32 %v2256_v47, %v2254_v46  ;;  %v236_v36 = vld [vmem:[%s2051_s15 + $0x1f8] sm:$0xff] }
 0x14d   : > { %3135 = vst [vmem:[#allocation22_spill] sm:$0xff] %v2256_v47 }
 0x14e   : > { %605 = vst [vmem:[#allocation2 + $0x180] sm:$0xff] %v413_v37  ;;  %530 = vxpose.xlu1.b32.cont [6/16] %v220_v45, 128  ;;  %1137 = vxpose.xlu2.b32.cont [6/16] %v1073_v49, 128  ;;  %v1075_v49 = vmul.f32 0.35355338, %v947_v30  ;;  %v244_v30 = vld [vmem:[%s2051_s15 + $0x238] sm:$0xff] }
 0x14f   : > { %498 = vxpose.xlu0.b32.cont [6/16] %v219_v48, 128  ;;  %v235_v48 = vld [vmem:[%s2051_s15 + $0x1f0] sm:$0xff] }
 0x152   : > { %v446_v1 = vpop.trf.xlu1 }
 0x153   : > { %v414_v4 = vpop.trf.xlu0  ;;  %622 = vst [vmem:[#allocation2 + $0x208] sm:$0xff] %v446_v1  ;;  %v2289_v1 = vld [vmem:[#allocation2 + $0xd1] ss:$2 sm:$0xff] }
 0x154   : > { %606 = vst [vmem:[#allocation2 + $0x188] sm:$0xff] %v414_v4  ;;  %v949_v4 = vadd.f32 %v2191_v17, %v2189_v15 }
 0x155   : > { %3139 = vst [vmem:[#allocation26_spill] sm:$0xff] %v2289_v1 }
 0x156   : > { %531 = vxpose.xlu1.b32.cont [7/16] %v228_v5, 128  ;;  %1138 = vxpose.xlu2.b32.cont [7/16] %v1074_v22, 128  ;;  %v394_v5 = vpop.trf.xlu2  ;;  %v1077_v18 = vmul.f32 0.35355338, %v949_v4 }
 0x157   : > { %499 = vxpose.xlu0.b32.cont [7/16] %v227_v21, 128  ;;  %v948_v21 = vadd.f32 %v2173_v60, %v2171_v59  ;;  %602 = vst [vmem:[#allocation2 + $0x168] sm:$0xff] %v394_v5 }
 0x15a   : > { %v447_v32 = vpop.trf.xlu1 }
 0x15b   : > { %v415_v33 = vpop.trf.xlu0  ;;  %623 = vst [vmem:[#allocation2 + $0x210] sm:$0xff] %v447_v32  ;;  %v2280_v37 = vld [vmem:[#allocation2 + $0x180] ss:$2 sm:$0xff]  ;;  %v2282_v45 = vld [vmem:[#allocation2 + $0x181] ss:$2 sm:$0xff] }
 0x15c   : > { %607 = vst [vmem:[#allocation2 + $0x190] sm:$0xff] %v415_v33  ;;  %v2296_v32 = vld [vmem:[#allocation2 + $0x130] ss:$2 sm:$0xff]  ;;  %v2298_v33 = vld [vmem:[#allocation2 + $0x131] ss:$2 sm:$0xff] }
 0x15e   : > { %532 = vxpose.xlu1.b32.cont [8/16] %v236_v36, 128  ;;  %1139 = vxpose.xlu2.b32.cont [8/16] %v1075_v49, 128  ;;  %v243_v36 = vld [vmem:[%s2051_s15 + $0x230] sm:$0xff]  ;;  %v1076_v49 = vmul.f32 0.35355338, %v948_v21  ;;  %v395_v5 = vpop.trf.xlu2 }
 0x15f   : > { %500 = vxpose.xlu0.b32.cont [8/16] %v235_v48, 128  ;;  %603 = vst [vmem:[#allocation2 + $0x170] sm:$0xff] %v395_v5  ;;  %v251_v21 = vld [vmem:[%s2051_s15 + $0x270] sm:$0xff]  ;;  %v951_v5 = vadd.f32 %v2237_v8, %v2235_v7  ;;  %v276_v48 = vld [vmem:[%s2051_s15 + $0x338] sm:$0xff] }
 0x162   : > { %v448_v22 = vpop.trf.xlu1 }
 0x163   : > { %v416_v28 = vpop.trf.xlu0  ;;  %624 = vst [vmem:[#allocation2 + $0x218] sm:$0xff] %v448_v22 }
 0x164   : > { %608 = vst [vmem:[#allocation2 + $0x198] sm:$0xff] %v416_v28 }
 0x166   : > { %533 = vxpose.xlu1.b32.cont [9/16] %v244_v30, 128  ;;  %1140 = vxpose.xlu2.b32.cont [9/16] %v1076_v49, 128  ;;  %v2315_v49 = vld [vmem:[#allocation2 + $0xe1] ss:$2 sm:$0xff]  ;;  %v2322_v30 = vld [vmem:[#allocation2 + $0x140] ss:$2 sm:$0xff] }
 0x167   : > { %501 = vxpose.xlu0.b32.cont [9/16] %v243_v36, 128  ;;  %v2313_v36 = vld [vmem:[#allocation2 + $0xe0] ss:$2 sm:$0xff]  ;;  %3141 = vst [vmem:[#allocation28_spill] sm:$0xff] %v2315_v49 }
 0x168   : > { %3140 = vst [vmem:[#allocation27_spill] sm:$0xff] %v2313_v36 }
 0x16a   : > { %v449_v22 = vpop.trf.xlu1 }
 0x16b   : > { %v417_v62 = vpop.trf.xlu0  ;;  %625 = vst [vmem:[#allocation2 + $0x220] sm:$0xff] %v449_v22  ;;  %v2306_v44 = vld [vmem:[#allocation2 + $0x190] ss:$2 sm:$0xff]  ;;  %v2308_v28 = vld [vmem:[#allocation2 + $0x191] ss:$2 sm:$0xff]  ;;  %v396_v22 = vpop.trf.xlu2 }
 0x16c   : > { %609 = vst [vmem:[#allocation2 + $0x1a0] sm:$0xff] %v417_v62  ;;  %v950_v62 = vadd.f32 %v2211_v42, %v2209_v39 }
 0x16d   : > { %604 = vst [vmem:[#allocation2 + $0x178] sm:$0xff] %v396_v22 }
 0x16e   : > { %534 = vxpose.xlu1.b32.cont [10/16] %v252_v11, 128  ;;  %1141 = vxpose.xlu2.b32.cont [10/16] %v1077_v18, 128  ;;  %v259_v18 = vld [vmem:[%s2051_s15 + $0x2b0] sm:$0xff]  ;;  %v1078_v11 = vmul.f32 0.35355338, %v950_v62 }
 0x16f   : > { %502 = vxpose.xlu0.b32.cont [10/16] %v251_v21, 128  ;;  %v267_v62 = vld [vmem:[%s2051_s15 + $0x2f0] sm:$0xff]  ;;  %v1079_v21 = vmul.f32 0.35355338, %v951_v5 }
 0x172   : > { %v450_v4 = vpop.trf.xlu1 }
 0x173   : > { %v418_v61 = vpop.trf.xlu0  ;;  %626 = vst [vmem:[#allocation2 + $0x228] sm:$0xff] %v450_v4  ;;  %v477_v22 = vpop.trf.xlu2 }
 0x174   : > { %610 = vst [vmem:[#allocation2 + $0x1a8] sm:$0xff] %v418_v61 }
 0x175   : > { %637 = vst [vmem:[#allocation2 + $0x280] sm:$0xff] %v477_v22  ;;  %v953_v22 = vadd.f32 %v2289_v1, %v2287_v0  ;;  %v2376_v1 = vld [vmem:[#allocation2 + $0x161] ss:$2 sm:$0xff]  ;;  %v300_v0 = vld [vmem:[%s2051_s15 + $0x3f8] sm:$0xff] }
 0x176   : > { %535 = vxpose.xlu1.b32.cont [11/16] %v260_v63, 128  ;;  %1142 = vxpose.xlu2.b32.cont [11/16] %v1078_v11, 128  ;;  %v2341_v11 = vld [vmem:[#allocation2 + $0xf1] ss:$2 sm:$0xff]  ;;  %v2348_v63 = vld [vmem:[#allocation2 + $0x150] ss:$2 sm:$0xff]  ;;  %3147 = vst [vmem:[#allocation34_spill] sm:$0xff] %v2376_v1 }
 0x177   : > { %503 = vxpose.xlu0.b32.cont [11/16] %v259_v18, 128  ;;  %v2339_v18 = vld [vmem:[#allocation2 + $0xf0] ss:$2 sm:$0xff]  ;;  %3143 = vst [vmem:[#allocation30_spill] sm:$0xff] %v2341_v11 }
 0x178   : > { %3142 = vst [vmem:[#allocation29_spill] sm:$0xff] %v2339_v18 }
 0x17a   : > { %v451_v4 = vpop.trf.xlu1 }
 0x17b   : > { %v419_v6 = vpop.trf.xlu0  ;;  %627 = vst [vmem:[#allocation2 + $0x230] sm:$0xff] %v451_v4  ;;  %v2332_v12 = vld [vmem:[#allocation2 + $0x1a0] ss:$2 sm:$0xff]  ;;  %v2334_v61 = vld [vmem:[#allocation2 + $0x1a1] ss:$2 sm:$0xff]  ;;  %v478_v4 = vpop.trf.xlu2 }
 0x17c   : > { %611 = vst [vmem:[#allocation2 + $0x1b0] sm:$0xff] %v419_v6  ;;  %v952_v6 = vadd.f32 %v2263_v57, %v2261_v53  ;;  %v299_v57 = vld [vmem:[%s2051_s15 + $0x3f0] sm:$0xff] }
 0x17d   : > { %638 = vst [vmem:[#allocation2 + $0x288] sm:$0xff] %v478_v4 }
 0x17e   : > { %536 = vxpose.xlu1.b32.cont [12/16] %v268_v38, 128  ;;  %1143 = vxpose.xlu2.b32.cont [12/16] %v1079_v21, 128  ;;  %v275_v38 = vld [vmem:[%s2051_s15 + $0x330] sm:$0xff]  ;;  %v1080_v21 = vmul.f32 0.35355338, %v952_v6 }
 0x17f   : > { %504 = vxpose.xlu0.b32.cont [12/16] %v267_v62, 128  ;;  %v283_v6 = vld [vmem:[%s2051_s15 + $0x370] sm:$0xff]  ;;  %v1081_v62 = vmul.f32 0.35355338, %v953_v22 }
 0x182   : > { %v452_v5 = vpop.trf.xlu1 }
 0x183   : > { %v420_v58 = vpop.trf.xlu0  ;;  %628 = vst [vmem:[#allocation2 + $0x238] sm:$0xff] %v452_v5  ;;  %v479_v4 = vpop.trf.xlu2 }
 0x184   : > { %612 = vst [vmem:[#allocation2 + $0x1b8] sm:$0xff] %v420_v58  ;;  %v2433_v7 = vld [vmem:[#allocation2 + $0x281] ss:$2 sm:$0xff] }
 0x185   : > { %639 = vst [vmem:[#allocation2 + $0x290] sm:$0xff] %v479_v4 }
 0x186   : > { %537 = vxpose.xlu1.b32.cont [13/16] %v276_v48, 128  ;;  %1144 = vxpose.xlu2.b32.cont [13/16] %v1080_v21, 128  ;;  %v2367_v21 = vld [vmem:[#allocation2 + $0x201] ss:$2 sm:$0xff]  ;;  %v2374_v48 = vld [vmem:[#allocation2 + $0x160] ss:$2 sm:$0xff]  ;;  %3157 = vst [vmem:[#allocation44_spill] sm:$0xff] %v2433_v7 }
 0x187   : > { %505 = vxpose.xlu0.b32.cont [13/16] %v275_v38, 128  ;;  %v2365_v38 = vld [vmem:[#allocation2 + $0x200] ss:$2 sm:$0xff]  ;;  %3145 = vst [vmem:[#allocation32_spill] sm:$0xff] %v2367_v21  ;;  %v962_v3 = vadd.f32 %v2376_v1, %v2374_v48 }
 0x188   : > { %3144 = vst [vmem:[#allocation31_spill] sm:$0xff] %v2365_v38 }
 0x189   : > { %3146 = vst [vmem:[#allocation33_spill] sm:$0xff] %v2374_v48 }
 0x18a   : > { %v453_v5 = vpop.trf.xlu1  ;;  %v2427_v8 = vld [vmem:[#allocation2 + $0x230] ss:$2 sm:$0xff] }
 0x18b   : > { %v421_v23 = vpop.trf.xlu0  ;;  %629 = vst [vmem:[#allocation2 + $0x240] sm:$0xff] %v453_v5  ;;  %v2358_v31 = vld [vmem:[#allocation2 + $0x1b0] ss:$2 sm:$0xff]  ;;  %v2360_v58 = vld [vmem:[#allocation2 + $0x1b1] ss:$2 sm:$0xff]  ;;  %v480_v5 = vpop.trf.xlu2 }
 0x18c   : > { %613 = vst [vmem:[#allocation2 + $0x1c0] sm:$0xff] %v421_v23  ;;  %v954_v23 = vadd.f32 %v2315_v49, %v2313_v36 }
 0x18d   : > { %640 = vst [vmem:[#allocation2 + $0x298] sm:$0xff] %v480_v5  ;;  %v955_v5 = vadd.f32 %v2341_v11, %v2339_v18  ;;  %v2401_v18 = vld [vmem:[#allocation2 + $0x170] ss:$2 sm:$0xff] }
 0x18e   : > { %538 = vxpose.xlu1.b32.cont [14/16] %v284_v29, 128  ;;  %1145 = vxpose.xlu2.b32.cont [14/16] %v1081_v62, 128  ;;  %v291_v29 = vld [vmem:[%s2051_s15 + $0x3b0] sm:$0xff]  ;;  %v1082_v62 = vmul.f32 0.35355338, %v954_v23  ;;  %3150 = vst [vmem:[#allocation37_spill] sm:$0xff] %v2401_v18 }
 0x18f   : > { %506 = vxpose.xlu0.b32.cont [14/16] %v283_v6, 128  ;;  %v2393_v6 = vld [vmem:[#allocation2 + $0x211] ss:$2 sm:$0xff]  ;;  %3154 = vst [vmem:[#allocation41_spill] sm:$0xff] %v2427_v8 }
 0x190   : > { %3149 = vst [vmem:[#allocation36_spill] sm:$0xff] %v2393_v6 }
 0x192   : > { %v454_v22 = vpop.trf.xlu1 }
 0x193   : > { %v422_v16 = vpop.trf.xlu0  ;;  %630 = vst [vmem:[#allocation2 + $0x248] sm:$0xff] %v454_v22  ;;  %v481_v4 = vpop.trf.xlu2  ;;  %v1083_v22 = vmul.f32 0.35355338, %v955_v5 }
 0x194   : > { %614 = vst [vmem:[#allocation2 + $0x1c8] sm:$0xff] %v422_v16  ;;  %v2463_v59 = vld [vmem:[#allocation2 + $0x291] ss:$2 sm:$0xff] }
 0x195   : > { %641 = vst [vmem:[#allocation2 + $0x2a0] sm:$0xff] %v481_v4  ;;  %v972_v4 = vadd.f32 %v2367_v21, %v2365_v38  ;;  %v2413_v38 = vld [vmem:[#allocation2 + $0x221] ss:$2 sm:$0xff] }
 0x196   : > { %539 = vxpose.xlu1.b32.cont [15/16] %v292_v54, 128  ;;  %1146 = vxpose.xlu2.b32.cont [15/16] %v1082_v62, 128  ;;  %v2391_v62 = vld [vmem:[#allocation2 + $0x210] ss:$2 sm:$0xff]  ;;  %3153 = vst [vmem:[#allocation40_spill] sm:$0xff] %v2413_v38 }
 0x197   : > { %507 = vxpose.xlu0.b32.cont [15/16] %v291_v29, 128  ;;  %3148 = vst [vmem:[#allocation35_spill] sm:$0xff] %v2391_v62  ;;  %v1100_v5 = vmul.f32 0.35355338, %v972_v4  ;;  %v957_v4 = vadd.f32 %v2246_v25, %v2244_v24 }
 0x198   : > { %3163 = vst [vmem:[#allocation50_spill] sm:$0xff] %v2463_v59 }
 0x19a   : > { %v455_v49 = vpop.trf.xlu1  ;;  %v2443_v42 = vld [vmem:[#allocation2 + $0x241] ss:$2 sm:$0xff] }
 0x19b   : > { %v423_v36 = vpop.trf.xlu0  ;;  %631 = vst [vmem:[#allocation2 + $0x250] sm:$0xff] %v455_v49  ;;  %v2384_v16 = vld [vmem:[#allocation2 + $0x1c0] ss:$2 sm:$0xff]  ;;  %v2386_v23 = vld [vmem:[#allocation2 + $0x1c1] ss:$2 sm:$0xff]  ;;  %v482_v29 = vpop.trf.xlu2 }
 0x19c   : > { %615 = vst [vmem:[#allocation2 + $0x1d0] sm:$0xff] %v423_v36  ;;  %v956_v36 = vadd.f32 %v2220_v51, %v2218_v50  ;;  %v2411_v49 = vld [vmem:[#allocation2 + $0x220] ss:$2 sm:$0xff] }
 0x19d   : > { %642 = vst [vmem:[#allocation2 + $0x2a8] sm:$0xff] %v482_v29 }
 0x19e   : > { %540 = vxpose.xlu1.b32.end [16/16] %v300_v0, 128  ;;  %1147 = vxpose.xlu2.b32.end [16/16] %v1083_v22, 128  ;;  %v2403_v0 = vld [vmem:[#allocation2 + $0x171] ss:$2 sm:$0xff]  ;;  %v1084_v21 = vmul.f32 0.35355338, %v956_v36  ;;  %3152 = vst [vmem:[#allocation39_spill] sm:$0xff] %v2411_v49 }
 0x19f   : > { %508 = vxpose.xlu0.b32.end [16/16] %v299_v57, 128  ;;  %3151 = vst [vmem:[#allocation38_spill] sm:$0xff] %v2403_v0  ;;  %v973_v57 = vadd.f32 %v2393_v6, %v2391_v62 }
 0x1a0   : > { %3159 = vst [vmem:[#allocation46_spill] sm:$0xff] %v2443_v42 }
 0x1a2   : > { %v456_v54 = vpop.trf.xlu1 }
 0x1a3   : > { %v424_v11 = vpop.trf.xlu0  ;;  %632 = vst [vmem:[#allocation2 + $0x258] sm:$0xff] %v456_v54  ;;  %v483_v29 = vpop.trf.xlu2  ;;  %v1101_v54 = vmul.f32 0.35355338, %v973_v57  ;;  %v974_v57 = vadd.f32 %v2413_v38, %v2411_v49  ;;  %v959_v38 = vadd.f32 %v2298_v33, %v2296_v32  ;;  %v2441_v49 = vld [vmem:[#allocation2 + $0x240] ss:$2 sm:$0xff] }
 0x1a4   : > { %616 = vst [vmem:[#allocation2 + $0x1d8] sm:$0xff] %v424_v11  ;;  %v2487_v35 = vld [vmem:[#allocation2 + $0x2a0] ss:$2 sm:$0xff] }
 0x1a5   : > { %643 = vst [vmem:[#allocation2 + $0x2b0] sm:$0xff] %v483_v29  ;;  %v1102_v62 = vmul.f32 0.35355338, %v974_v57 }
 0x1a6   : > { %1196 = vxpose.xlu1.b32.start [1/16] %v1100_v5, 128  ;;  %v1085_v5 = vmul.f32 0.35355338, %v957_v4  ;;  %3158 = vst [vmem:[#allocation45_spill] sm:$0xff] %v2441_v49 }
 0x1a7   : > { %1164 = vxpose.xlu0.b32.start [1/16] %v1084_v21, 128  ;;  %3166 = vst [vmem:[#allocation53_spill] sm:$0xff] %v2487_v35 }
 0x1aa   : > { %v457_v11 = vpop.trf.xlu1  ;;  %v2457_v60 = vld [vmem:[#allocation2 + $0x250] ss:$2 sm:$0xff] }
 0x1ab   : > { %v425_v53 = vpop.trf.xlu0  ;;  %633 = vst [vmem:[#allocation2 + $0x260] sm:$0xff] %v457_v11  ;;  %v2415_v22 = vld [vmem:[#allocation2 + $0x1d0] ss:$2 sm:$0xff]  ;;  %v2417_v36 = vld [vmem:[#allocation2 + $0x1d1] ss:$2 sm:$0xff]  ;;  %v484_v6 = vpop.trf.xlu2  ;;  %v958_v11 = vadd.f32 %v2272_v20, %v2270_v19 }
 0x1ac   : > { %617 = vst [vmem:[#allocation2 + $0x1e0] sm:$0xff] %v425_v53  ;;  %v2429_v53 = vld [vmem:[#allocation2 + $0x231] ss:$2 sm:$0xff] }
 0x1ad   : > { %644 = vst [vmem:[#allocation2 + $0x2b8] sm:$0xff] %v484_v6  ;;  %v1086_v6 = vmul.f32 0.35355338, %v958_v11  ;;  %v975_v57 = vadd.f32 %v2429_v53, %v2427_v8 }
 0x1ae   : > { %1197 = vxpose.xlu1.b32.cont [2/16] %v1101_v54, 128  ;;  %3155 = vst [vmem:[#allocation42_spill] sm:$0xff] %v2429_v53  ;;  %v2431_v54 = vld [vmem:[#allocation2 + $0x280] ss:$2 sm:$0xff]  ;;  %v961_v53 = vadd.f32 %v2350_v43, %v2348_v63 }
 0x1af   : > { %1165 = vxpose.xlu0.b32.cont [2/16] %v1085_v5, 128  ;;  %3156 = vst [vmem:[#allocation43_spill] sm:$0xff] %v2431_v54 }
 0x1b0   : > { %3160 = vst [vmem:[#allocation47_spill] sm:$0xff] %v2457_v60 }
 0x1b2   : > { %v458_v21 = vpop.trf.xlu1 }
 0x1b3   : > { %v426_v4 = vpop.trf.xlu0  ;;  %634 = vst [vmem:[#allocation2 + $0x268] sm:$0xff] %v458_v21  ;;  %v485_v29 = vpop.trf.xlu2  ;;  %v1103_v21 = vmul.f32 0.35355338, %v975_v57 }
 0x1b4   : > { %618 = vst [vmem:[#allocation2 + $0x1e8] sm:$0xff] %v426_v4 }
 0x1b5   : > { %645 = vst [vmem:[#allocation2 + $0x2c0] sm:$0xff] %v485_v29  ;;  %v1087_v29 = vmul.f32 0.35355338, %v959_v38 }
 0x1b6   : > { %1198 = vxpose.xlu1.b32.cont [3/16] %v1102_v62, 128 }
 0x1b7   : > { %1166 = vxpose.xlu0.b32.cont [3/16] %v1086_v6, 128  ;;  %v976_v6 = vadd.f32 %v2443_v42, %v2441_v49 }
 0x1b9   : > { %v1104_v15 = vmul.f32 0.35355338, %v976_v6 }
 0x1ba   : > { %v459_v4 = vpop.trf.xlu1  ;;  %v2471_v8 = vld [vmem:[#allocation2 + $0x260] ss:$2 sm:$0xff]  ;;  %v2473_v46 = vld [vmem:[#allocation2 + $0x261] ss:$2 sm:$0xff] }
 0x1bb   : > { %v427_v39 = vpop.trf.xlu0  ;;  %635 = vst [vmem:[#allocation2 + $0x270] sm:$0xff] %v459_v4  ;;  %v2445_v5 = vld [vmem:[#allocation2 + $0x1e0] ss:$2 sm:$0xff]  ;;  %v2447_v62 = vld [vmem:[#allocation2 + $0x1e1] ss:$2 sm:$0xff]  ;;  %v486_v17 = vpop.trf.xlu2  ;;  %v960_v4 = vadd.f32 %v2324_v52, %v2322_v30 }
 0x1bc   : > { %619 = vst [vmem:[#allocation2 + $0x1f0] sm:$0xff] %v427_v39  ;;  %v2459_v39 = vld [vmem:[#allocation2 + $0x251] ss:$2 sm:$0xff] }
 0x1bd   : > { %646 = vst [vmem:[#allocation2 + $0x2c8] sm:$0xff] %v486_v17  ;;  %v1088_v57 = vmul.f32 0.35355338, %v960_v4  ;;  %v977_v17 = vadd.f32 %v2459_v39, %v2457_v60  ;;  %v978_v4 = vadd.f32 %v2473_v46, %v2471_v8 }
 0x1be   : > { %1199 = vxpose.xlu1.b32.cont [4/16] %v1103_v21, 128  ;;  %3161 = vst [vmem:[#allocation48_spill] sm:$0xff] %v2459_v39  ;;  %v2461_v21 = vld [vmem:[#allocation2 + $0x290] ss:$2 sm:$0xff] }
 0x1bf   : > { %1167 = vxpose.xlu0.b32.cont [4/16] %v1087_v29, 128  ;;  %3162 = vst [vmem:[#allocation49_spill] sm:$0xff] %v2461_v21  ;;  %v1106_v2 = vmul.f32 0.35355338, %v978_v4 }
 0x1c0   : > { %3164 = vst [vmem:[#allocation51_spill] sm:$0xff] %v2471_v8 }
 0x1c1   : > { %3165 = vst [vmem:[#allocation52_spill] sm:$0xff] %v2473_v46 }
 0x1c2   : > { %v460_v11 = vpop.trf.xlu1 }
 0x1c3   : > { %v428_v38 = vpop.trf.xlu0  ;;  %636 = vst [vmem:[#allocation2 + $0x278] sm:$0xff] %v460_v11  ;;  %v487_v6 = vpop.trf.xlu2  ;;  %v1105_v11 = vmul.f32 0.35355338, %v977_v17 }
 0x1c4   : > { %620 = vst [vmem:[#allocation2 + $0x1f8] sm:$0xff] %v428_v38 }
 0x1c5   : > { %647 = vst [vmem:[#allocation2 + $0x2d0] sm:$0xff] %v487_v6 }
 0x1c6   : > { %1200 = vxpose.xlu1.b32.cont [5/16] %v1104_v15, 128 }
 0x1c7   : > { %1168 = vxpose.xlu0.b32.cont [5/16] %v1088_v57, 128  ;;  %v1089_v57 = vmul.f32 0.35355338, %v961_v53 }
 0x1ca   : > { %v2491_v53 = vld [vmem:[#allocation2 + $0x270] ss:$2 sm:$0xff] }
 0x1cb   : > { %v509_v47 = vpop.trf.xlu0  ;;  %v2475_v38 = vld [vmem:[#allocation2 + $0x1f0] ss:$2 sm:$0xff]  ;;  %v2477_v29 = vld [vmem:[#allocation2 + $0x1f1] ss:$2 sm:$0xff]  ;;  %v488_v6 = vpop.trf.xlu2  ;;  %3168 = vst [vmem:[#allocation55_spill] sm:$0xff] %v2491_v53 }
 0x1cc   : > { %653 = vst [vmem:[#allocation2 + $0x300] sm:$0xff] %v509_v47  ;;  %v2489_v47 = vld [vmem:[#allocation2 + $0x2a1] ss:$2 sm:$0xff] }
 0x1cd   : > { %648 = vst [vmem:[#allocation2 + $0x2d8] sm:$0xff] %v488_v6  ;;  %v963_v6 = vadd.f32 %v2403_v0, %v2401_v18  ;;  %v2515_v18 = vld [vmem:[#allocation2 + $0x2b0] ss:$2 sm:$0xff] }
 0x1ce   : > { %1201 = vxpose.xlu1.b32.cont [6/16] %v1105_v11, 128  ;;  %3167 = vst [vmem:[#allocation54_spill] sm:$0xff] %v2489_v47  ;;  %v2493_v11 = vld [vmem:[#allocation2 + $0x271] ss:$2 sm:$0xff] }
 0x1cf   : > { %1169 = vxpose.xlu0.b32.cont [6/16] %v1089_v57, 128  ;;  %3169 = vst [vmem:[#allocation56_spill] sm:$0xff] %v2493_v11  ;;  %v1090_v57 = vmul.f32 0.35355338, %v962_v3  ;;  %v979_v42 = vadd.f32 %v2493_v11, %v2491_v53  ;;  %v970_v11 = vadd.f32 %v2447_v62, %v2445_v5 }
 0x1d0   : > { %3170 = vst [vmem:[#allocation57_spill] sm:$0xff] %v2515_v18 }
 0x1d1   : > { %v1107_v49 = vmul.f32 0.35355338, %v979_v42  ;;  %v980_v42 = vadd.f32 %v2433_v7, %v2431_v54 }
 0x1d3   : > { %v510_v15 = vpop.trf.xlu0  ;;  %v489_v4 = vpop.trf.xlu2 }
 0x1d4   : > { %654 = vst [vmem:[#allocation2 + $0x308] sm:$0xff] %v510_v15  ;;  %v1091_v15 = vmul.f32 0.35355338, %v963_v6  ;;  %v982_v6 = vadd.f32 %v2489_v47, %v2487_v35  ;;  %v2563_v46 = vld [vmem:[#allocation2 + $0x2d0] ss:$2 sm:$0xff] }
 0x1d5   : > { %649 = vst [vmem:[#allocation2 + $0x2e0] sm:$0xff] %v489_v4 }
 0x1d6   : > { %1202 = vxpose.xlu1.b32.cont [7/16] %v1106_v2, 128  ;;  %v2517_v2 = vld [vmem:[#allocation2 + $0x2b1] ss:$2 sm:$0xff]  ;;  %3174 = vst [vmem:[#allocation61_spill] sm:$0xff] %v2563_v46 }
 0x1d7   : > { %1170 = vxpose.xlu0.b32.cont [7/16] %v1090_v57, 128  ;;  %3171 = vst [vmem:[#allocation58_spill] sm:$0xff] %v2517_v2 }
 0x1db   : > { %v511_v1 = vpop.trf.xlu0  ;;  %v2501_v48 = vld [vmem:[#allocation2 + $0x300] ss:$2 sm:$0xff]  ;;  %v2503_v34 = vld [vmem:[#allocation2 + $0x301] ss:$2 sm:$0xff]  ;;  %v490_v4 = vpop.trf.xlu2 }
 0x1dc   : > { %655 = vst [vmem:[#allocation2 + $0x310] sm:$0xff] %v511_v1  ;;  %v988_v3 = vadd.f32 %v2503_v34, %v2501_v48  ;;  %v964_v1 = vadd.f32 %v2282_v45, %v2280_v37 }
 0x1dd   : > { %650 = vst [vmem:[#allocation2 + $0x2e8] sm:$0xff] %v490_v4  ;;  %v965_v4 = vadd.f32 %v2308_v28, %v2306_v44 }
 0x1de   : > { %1203 = vxpose.xlu1.b32.cont [8/16] %v1107_v49, 128  ;;  %v1116_v57 = vmul.f32 0.35355338, %v988_v3  ;;  %v1108_v49 = vmul.f32 0.35355338, %v980_v42  ;;  %v1092_v3 = vmul.f32 0.35355338, %v964_v1 }
 0x1df   : > { %1171 = vxpose.xlu0.b32.cont [8/16] %v1091_v15, 128  ;;  %v541_v15 = vpop.trf.xlu1 }
 0x1e0   : > { %1228 = vxpose.xlu2.b32.start [1/16] %v1116_v57, 128  ;;  %v981_v57 = vadd.f32 %v2463_v59, %v2461_v21  ;;  %669 = vst [vmem:[#allocation2 + $0x380] sm:$0xff] %v541_v15  ;;  %v1110_v21 = vmul.f32 0.35355338, %v982_v6 }
 0x1e2   : > { %v1109_v42 = vmul.f32 0.35355338, %v981_v57  ;;  %v966_v57 = vadd.f32 %v2334_v61, %v2332_v12 }
 0x1e3   : > { %v512_v0 = vpop.trf.xlu0  ;;  %v491_v17 = vpop.trf.xlu2 }
 0x1e4   : > { %656 = vst [vmem:[#allocation2 + $0x318] sm:$0xff] %v512_v0 }
 0x1e5   : > { %651 = vst [vmem:[#allocation2 + $0x2f0] sm:$0xff] %v491_v17  ;;  %v1094_v17 = vmul.f32 0.35355338, %v966_v57 }
 0x1e6   : > { %1204 = vxpose.xlu1.b32.cont [9/16] %v1108_v49, 128 }
 0x1e7   : > { %1172 = vxpose.xlu0.b32.cont [9/16] %v1092_v3, 128  ;;  %v1093_v3 = vmul.f32 0.35355338, %v965_v4  ;;  %v2539_v4 = vld [vmem:[#allocation2 + $0x2c0] ss:$2 sm:$0xff] }
 0x1e8   : > { %3172 = vst [vmem:[#allocation59_spill] sm:$0xff] %v2539_v4 }
 0x1eb   : > { %v513_v7 = vpop.trf.xlu0  ;;  %v2525_v54 = vld [vmem:[#allocation2 + $0x310] ss:$2 sm:$0xff]  ;;  %v2527_v0 = vld [vmem:[#allocation2 + $0x311] ss:$2 sm:$0xff]  ;;  %v492_v59 = vpop.trf.xlu2 }
 0x1ec   : > { %657 = vst [vmem:[#allocation2 + $0x320] sm:$0xff] %v513_v7  ;;  %v989_v1 = vadd.f32 %v2527_v0, %v2525_v54  ;;  %v542_v7 = vpop.trf.xlu1 }
 0x1ed   : > { %652 = vst [vmem:[#allocation2 + $0x2f8] sm:$0xff] %v492_v59  ;;  %v967_v59 = vadd.f32 %v2360_v58, %v2358_v31 }
 0x1ee   : > { %1205 = vxpose.xlu1.b32.cont [10/16] %v1109_v42, 128  ;;  %v1117_v15 = vmul.f32 0.35355338, %v989_v1  ;;  %670 = vst [vmem:[#allocation2 + $0x388] sm:$0xff] %v542_v7  ;;  %v2541_v42 = vld [vmem:[#allocation2 + $0x2c1] ss:$2 sm:$0xff] }
 0x1ef   : > { %1173 = vxpose.xlu0.b32.cont [10/16] %v1093_v3, 128  ;;  %3173 = vst [vmem:[#allocation60_spill] sm:$0xff] %v2541_v42  ;;  %v983_v3 = vadd.f32 %v2517_v2, %v2515_v18  ;;  %v1095_v57 = vmul.f32 0.35355338, %v967_v59  ;;  %v984_v1 = vadd.f32 %v2541_v42, %v2539_v4  ;;  %v2565_v59 = vld [vmem:[#allocation2 + $0x2d1] ss:$2 sm:$0xff] }
 0x1f0   : > { %1229 = vxpose.xlu2.b32.cont [2/16] %v1117_v15, 128  ;;  %3175 = vst [vmem:[#allocation62_spill] sm:$0xff] %v2565_v59 }
 0x1f1   : > { %v1111_v6 = vmul.f32 0.35355338, %v983_v3  ;;  %v1112_v2 = vmul.f32 0.35355338, %v984_v1  ;;  %v2573_v3 = vld [vmem:[#allocation2 + $0x2e0] ss:$2 sm:$0xff] }
 0x1f2   : > { %3176 = vst [vmem:[#allocation63_spill] sm:$0xff] %v2573_v3 }
 0x1f3   : > { %v514_v49 = vpop.trf.xlu0 }
 0x1f4   : > { %658 = vst [vmem:[#allocation2 + $0x328] sm:$0xff] %v514_v49  ;;  %v543_v15 = vpop.trf.xlu1  ;;  %v2595_v53 = vld [vmem:[#allocation2 + $0x2f0] ss:$2 sm:$0xff]  ;;  %v2597_v8 = vld [vmem:[#allocation2 + $0x2f1] ss:$2 sm:$0xff] }
 0x1f5   : > { %671 = vst [vmem:[#allocation2 + $0x390] sm:$0xff] %v543_v15 }
 0x1f6   : > { %1206 = vxpose.xlu1.b32.cont [11/16] %v1110_v21, 128 }
 0x1f7   : > { %1174 = vxpose.xlu0.b32.cont [11/16] %v1094_v17, 128 }
 0x1fb   : > { %v515_v7 = vpop.trf.xlu0  ;;  %v2549_v47 = vld [vmem:[#allocation2 + $0x320] ss:$2 sm:$0xff]  ;;  %v2551_v35 = vld [vmem:[#allocation2 + $0x321] ss:$2 sm:$0xff] }
 0x1fc   : > { %659 = vst [vmem:[#allocation2 + $0x330] sm:$0xff] %v515_v7  ;;  %v990_v49 = vadd.f32 %v2551_v35, %v2549_v47  ;;  %v544_v15 = vpop.trf.xlu1  ;;  %v968_v7 = vadd.f32 %v2386_v23, %v2384_v16 }
 0x1fd   : > { %672 = vst [vmem:[#allocation2 + $0x398] sm:$0xff] %v544_v15  ;;  %v969_v15 = vadd.f32 %v2417_v36, %v2415_v22 }
 0x1fe   : > { %1207 = vxpose.xlu1.b32.cont [12/16] %v1111_v6, 128  ;;  %v1118_v17 = vmul.f32 0.35355338, %v990_v49  ;;  %v1096_v49 = vmul.f32 0.35355338, %v968_v7  ;;  %v2579_v6 = vld [vmem:[#allocation2 + $0x2e1] ss:$2 sm:$0xff] }
 0x1ff   : > { %1175 = vxpose.xlu0.b32.cont [12/16] %v1095_v57, 128  ;;  %v985_v57 = vadd.f32 %v2565_v59, %v2563_v46  ;;  %3177 = vst [vmem:[#allocation64_spill] sm:$0xff] %v2579_v6  ;;  %v2585_v59 = vld [vmem:[#allocation2 + $0x380] ss:$2 sm:$0xff]  ;;  %v986_v46 = vadd.f32 %v2579_v6, %v2573_v3 }
 0x200   : > { %1230 = vxpose.xlu2.b32.cont [3/16] %v1118_v17, 128 }
 0x201   : > { %v1113_v1 = vmul.f32 0.35355338, %v985_v57  ;;  %v2587_v57 = vld [vmem:[#allocation2 + $0x381] ss:$2 sm:$0xff] }
 0x203   : > { %v516_v18 = vpop.trf.xlu0 }
 0x204   : > { %660 = vst [vmem:[#allocation2 + $0x338] sm:$0xff] %v516_v18  ;;  %v545_v17 = vpop.trf.xlu1 }
 0x205   : > { %673 = vst [vmem:[#allocation2 + $0x3a0] sm:$0xff] %v545_v17 }
 0x206   : > { %1208 = vxpose.xlu1.b32.cont [13/16] %v1112_v2, 128 }
 0x207   : > { %1176 = vxpose.xlu0.b32.cont [13/16] %v1096_v49, 128  ;;  %v1097_v49 = vmul.f32 0.35355338, %v969_v15  ;;  %v1114_v15 = vmul.f32 0.35355338, %v986_v46 }
 0x20b   : > { %v517_v21 = vpop.trf.xlu0  ;;  %v2575_v42 = vld [vmem:[#allocation2 + $0x330] ss:$2 sm:$0xff]  ;;  %v2577_v18 = vld [vmem:[#allocation2 + $0x331] ss:$2 sm:$0xff] }
 0x20c   : > { %661 = vst [vmem:[#allocation2 + $0x340] sm:$0xff] %v517_v21  ;;  %v991_v2 = vadd.f32 %v2577_v18, %v2575_v42  ;;  %v546_v21 = vpop.trf.xlu1 }
 0x20d   : > { %674 = vst [vmem:[#allocation2 + $0x3a8] sm:$0xff] %v546_v21  ;;  %v971_v21 = vadd.f32 %v2477_v29, %v2475_v38 }
 0x20e   : > { %1209 = vxpose.xlu1.b32.cont [14/16] %v1113_v1, 128  ;;  %v1119_v17 = vmul.f32 0.35355338, %v991_v2  ;;  %v1098_v2 = vmul.f32 0.35355338, %v970_v11  ;;  %v2615_v1 = vld [vmem:[#allocation2 + $0x391] ss:$2 sm:$0xff] }
 0x20f   : > { %1177 = vxpose.xlu0.b32.cont [14/16] %v1097_v49, 128  ;;  %v987_v49 = vadd.f32 %v2597_v8, %v2595_v53 }
 0x210   : > { %1231 = vxpose.xlu2.b32.cont [4/16] %v1119_v17, 128 }
 0x211   : > { %v1115_v46 = vmul.f32 0.35355338, %v987_v49 }
 0x213   : > { %v518_v7 = vpop.trf.xlu0 }
 0x214   : > { %662 = vst [vmem:[#allocation2 + $0x348] sm:$0xff] %v518_v7  ;;  %v547_v17 = vpop.trf.xlu1  ;;  %v3178_v7 = vsub.f32 %v2218_v50, %v2220_v51 }
 0x215   : > { %675 = vst [vmem:[#allocation2 + $0x3b0] sm:$0xff] %v547_v17  ;;  %v1148_v17 = vpop.trf.xlu2 }
 0x216   : > { %1210 = vxpose.xlu1.b32.cont [15/16] %v1114_v15, 128  ;;  %v1099_v15 = vmul.f32 0.35355338, %v971_v21  ;;  %v1340_v21 = vmul.f32 0.35355338, %v3178_v7  ;;  %1260 = vst [vmem:[%s2629_s16] sm:$0xff] %v1148_v17  ;;  %v3181_v17 = vsub.f32 %v2140_v26, %v2142_v27  ;;  %v3182_v26 = vsub.f32 %v2270_v19, %v2272_v20 }
 0x217   : > { %1178 = vxpose.xlu0.b32.cont [15/16] %v1098_v2, 128  ;;  %v2613_v2 = vld [vmem:[#allocation2 + $0x390] ss:$2 sm:$0xff]  ;;  %v3184_v19 = vsub.f32 %v2296_v32, %v2298_v33 }
 0x218   : > { %v1342_v27 = vmul.f32 0.35355338, %v3182_v26 }
 0x219   : > { %v1343_v20 = vmul.f32 0.35355338, %v3184_v19 }
 0x21b   : > { %v519_v4 = vpop.trf.xlu0  ;;  %v2605_v39 = vld [vmem:[#allocation2 + $0x340] ss:$2 sm:$0xff]  ;;  %v2607_v60 = vld [vmem:[#allocation2 + $0x341] ss:$2 sm:$0xff] }
 0x21c   : > { %663 = vst [vmem:[#allocation2 + $0x350] sm:$0xff] %v519_v4  ;;  %v992_v11 = vadd.f32 %v2607_v60, %v2605_v39  ;;  %v548_v4 = vpop.trf.xlu1 }
 0x21d   : > { %676 = vst [vmem:[#allocation2 + $0x3b8] sm:$0xff] %v548_v4  ;;  %v1325_v4 = vmul.f32 0.35355338, %v3181_v17 }
 0x21e   : > { %1211 = vxpose.xlu1.b32.end [16/16] %v1115_v46, 128  ;;  %v1120_v49 = vmul.f32 0.35355338, %v992_v11  ;;  %v3179_v46 = vsub.f32 %v2128_v13, %v2130_v14  ;;  %v3180_v13 = vsub.f32 %v2244_v24, %v2246_v25 }
 0x21f   : > { %1179 = vxpose.xlu0.b32.end [16/16] %v1099_v15, 128 }
 0x220   : > { %1232 = vxpose.xlu2.b32.cont [5/16] %v1120_v49, 128  ;;  %v1324_v11 = vmul.f32 0.35355338, %v3179_v46  ;;  %v1341_v14 = vmul.f32 0.35355338, %v3180_v13  ;;  %v2648_v46 = vld [vmem:[#allocation2 + $0x3a1] ss:$2 sm:$0xff]  ;;  %v3183_v13 = vsub.f32 %v2152_v40, %v2154_v41 }
 0x223   : > { %v520_v6 = vpop.trf.xlu0 }
 0x224   : > { %664 = vst [vmem:[#allocation2 + $0x358] sm:$0xff] %v520_v6  ;;  %v549_v15 = vpop.trf.xlu1  ;;  %v2674_v26 = vld [vmem:[#allocation2 + $0x3b0] ss:$2 sm:$0xff] }
 0x225   : > { %677 = vst [vmem:[#allocation2 + $0x3c0] sm:$0xff] %v549_v15  ;;  %v1149_v15 = vpop.trf.xlu2 }
 0x226   : > { %1420 = vxpose.xlu1.b32.start [1/16] %v1340_v21, 128  ;;  %v2646_v21 = vld [vmem:[#allocation2 + $0x3a0] ss:$2 sm:$0xff]  ;;  %1264 = vst [vmem:[%s2629_s16 + $0x20] sm:$0xff] %v1149_v15  ;;  %v3185_v15 = vsub.f32 %v2164_v55, %v2166_v56  ;;  %v3186_v55 = vsub.f32 %v2322_v30, %v2324_v52  ;;  %v3188_v52 = vsub.f32 %v2348_v63, %v2350_v43 }
 0x227   : > { %1388 = vxpose.xlu0.b32.start [1/16] %v1324_v11, 128  ;;  %v1062_v24 = vsub.f32 %v2646_v21, %v2648_v46 }
 0x228   : > { %v1344_v56 = vmul.f32 0.35355338, %v3186_v55  ;;  %v1345_v30 = vmul.f32 0.35355338, %v3188_v52  ;;  %v3193_v52 = vld [vmem:[#allocation34_spill] sm:$0xff] }
 0x22b   : > { %v521_v6 = vpop.trf.xlu0  ;;  %v2632_v50 = vld [vmem:[#allocation2 + $0x350] ss:$2 sm:$0xff]  ;;  %v2634_v51 = vld [vmem:[#allocation2 + $0x351] ss:$2 sm:$0xff] }
 0x22c   : > { %665 = vst [vmem:[#allocation2 + $0x360] sm:$0xff] %v521_v6  ;;  %v993_v7 = vadd.f32 %v2634_v51, %v2632_v50  ;;  %v1057_v49 = vsub.f32 %v2632_v50, %v2634_v51  ;;  %v550_v25 = vpop.trf.xlu1  ;;  %v3265_v51 = vld [vmem:[#allocation43_spill] sm:$0xff] }
 0x22d   : > { %678 = vst [vmem:[#allocation2 + $0x3c8] sm:$0xff] %v550_v25  ;;  %v1150_v17 = vpop.trf.xlu2 }
 0x22e   : > { %1421 = vxpose.xlu1.b32.cont [2/16] %v1341_v14, 128  ;;  %v1121_v11 = vmul.f32 0.35355338, %v993_v7  ;;  %v1326_v14 = vmul.f32 0.35355338, %v3183_v13  ;;  %1268 = vst [vmem:[%s2629_s16 + $0x40] sm:$0xff] %v1150_v17  ;;  %v3187_v17 = vsub.f32 %v2182_v9, %v2184_v10 }
 0x22f   : > { %1389 = vxpose.xlu0.b32.cont [2/16] %v1325_v4, 128 }
 0x230   : > { %1233 = vxpose.xlu2.b32.cont [6/16] %v1121_v11, 128 }
 0x233   : > { %v522_v6 = vpop.trf.xlu0 }
 0x234   : > { %666 = vst [vmem:[#allocation2 + $0x368] sm:$0xff] %v522_v6  ;;  %v551_v7 = vpop.trf.xlu1  ;;  %v1327_v6 = vmul.f32 0.35355338, %v3185_v15  ;;  %v2703_v55 = vld [vmem:[#allocation2 + $0x3c0] ss:$2 sm:$0xff] }
 0x235   : > { %679 = vst [vmem:[#allocation2 + $0x3d0] sm:$0xff] %v551_v7 }
 0x236   : > { %1422 = vxpose.xlu1.b32.cont [3/16] %v1342_v27, 128  ;;  %v2676_v27 = vld [vmem:[#allocation2 + $0x3b1] ss:$2 sm:$0xff] }
 0x237   : > { %1390 = vxpose.xlu0.b32.cont [3/16] %v1326_v14, 128  ;;  %v1063_v32 = vsub.f32 %v2674_v26, %v2676_v27  ;;  %v1151_v14 = vpop.trf.xlu2 }
 0x238   : > { %1272 = vst [vmem:[%s2629_s16 + $0x60] sm:$0xff] %v1151_v14 }
 0x23b   : > { %v523_v4 = vpop.trf.xlu0  ;;  %v2660_v11 = vld [vmem:[#allocation2 + $0x360] ss:$2 sm:$0xff]  ;;  %v2662_v25 = vld [vmem:[#allocation2 + $0x361] ss:$2 sm:$0xff] }
 0x23c   : > { %667 = vst [vmem:[#allocation2 + $0x370] sm:$0xff] %v523_v4  ;;  %v994_v40 = vadd.f32 %v2662_v25, %v2660_v11  ;;  %v1058_v41 = vsub.f32 %v2660_v11, %v2662_v25  ;;  %v552_v33 = vpop.trf.xlu1  ;;  %v1328_v4 = vmul.f32 0.35355338, %v3187_v17  ;;  %v3268_v25 = vld [vmem:[#allocation49_spill] sm:$0xff] }
 0x23d   : > { %680 = vst [vmem:[#allocation2 + $0x3d8] sm:$0xff] %v552_v33  ;;  %v3190_v33 = vld [vmem:[#allocation14_spill] sm:$0xff] }
 0x23e   : > { %1423 = vxpose.xlu1.b32.cont [4/16] %v1343_v20, 128  ;;  %v1122_v13 = vmul.f32 0.35355338, %v994_v40  ;;  %v1378_v50 = vmul.f32 0.35355338, %v1058_v41  ;;  %v3269_v41 = vld [vmem:[#allocation50_spill] sm:$0xff] }
 0x23f   : > { %1391 = vxpose.xlu0.b32.cont [4/16] %v1327_v6, 128  ;;  %v1152_v20 = vpop.trf.xlu2 }
 0x240   : > { %1234 = vxpose.xlu2.b32.cont [7/16] %v1122_v13, 128  ;;  %1276 = vst [vmem:[%s2629_s16 + $0x80] sm:$0xff] %v1152_v20  ;;  %v3189_v13 = vld [vmem:[#allocation13_spill] sm:$0xff] }
 0x241   : > { %v3191_v14 = vsub.f32 %v3189_v13, %v3190_v33  ;;  %v3195_v13 = vld [vmem:[#allocation17_spill] sm:$0xff]  ;;  %v3196_v33 = vld [vmem:[#allocation18_spill] sm:$0xff] }
 0x243   : > { %v524_v7 = vpop.trf.xlu0 }
 0x244   : > { %668 = vst [vmem:[#allocation2 + $0x378] sm:$0xff] %v524_v7  ;;  %v553_v19 = vpop.trf.xlu1  ;;  %v1329_v7 = vmul.f32 0.35355338, %v3191_v14  ;;  %v3197_v14 = vsub.f32 %v3195_v13, %v3196_v33  ;;  %v3201_v33 = vld [vmem:[#allocation21_spill] sm:$0xff] }
 0x245   : > { %681 = vst [vmem:[#allocation2 + $0x3e0] sm:$0xff] %v553_v19  ;;  %v996_v19 = vadd.f32 %v2587_v57, %v2585_v59 }
 0x246   : > { %1424 = vxpose.xlu1.b32.cont [5/16] %v1344_v56, 128  ;;  %v2705_v56 = vld [vmem:[#allocation2 + $0x3c1] ss:$2 sm:$0xff] }
 0x247   : > { %1392 = vxpose.xlu0.b32.cont [5/16] %v1328_v4, 128  ;;  %v1064_v43 = vsub.f32 %v2703_v55, %v2705_v56  ;;  %v1153_v4 = vpop.trf.xlu2 }
 0x248   : > { %1280 = vst [vmem:[%s2629_s16 + $0xa0] sm:$0xff] %v1153_v4  ;;  %v997_v4 = vadd.f32 %v2615_v1, %v2613_v2 }
 0x24b   : > { %v1180_v40 = vpop.trf.xlu0  ;;  %v2688_v15 = vld [vmem:[#allocation2 + $0x370] ss:$2 sm:$0xff]  ;;  %v2690_v6 = vld [vmem:[#allocation2 + $0x371] ss:$2 sm:$0xff] }
 0x24c   : > { %1261 = vst [vmem:[%s2629_s16 + $0x8] sm:$0xff] %v1180_v40  ;;  %v995_v9 = vadd.f32 %v2690_v6, %v2688_v15  ;;  %v1059_v10 = vsub.f32 %v2688_v15, %v2690_v6  ;;  %v554_v63 = vpop.trf.xlu1  ;;  %v3192_v40 = vld [vmem:[#allocation33_spill] sm:$0xff] }
 0x24d   : > { %682 = vst [vmem:[#allocation2 + $0x3e8] sm:$0xff] %v554_v63  ;;  %v3272_v6 = vld [vmem:[#allocation53_spill] sm:$0xff] }
 0x24e   : > { %1425 = vxpose.xlu1.b32.cont [6/16] %v1345_v30, 128  ;;  %v1123_v17 = vmul.f32 0.35355338, %v995_v9  ;;  %v3194_v30 = vsub.f32 %v3192_v40, %v3193_v52  ;;  %v3198_v40 = vld [vmem:[#allocation37_spill] sm:$0xff]  ;;  %v3199_v52 = vld [vmem:[#allocation38_spill] sm:$0xff]  ;;  %v1379_v11 = vmul.f32 0.35355338, %v1059_v10 }
 0x24f   : > { %1393 = vxpose.xlu0.b32.cont [6/16] %v1329_v7, 128  ;;  %v1330_v7 = vmul.f32 0.35355338, %v3197_v14  ;;  %v1154_v3 = vpop.trf.xlu2  ;;  %v3273_v10 = vld [vmem:[#allocation54_spill] sm:$0xff] }
 0x250   : > { %1235 = vxpose.xlu2.b32.cont [8/16] %v1123_v17, 128  ;;  %v1346_v9 = vmul.f32 0.35355338, %v3194_v30  ;;  %v1124_v17 = vmul.f32 0.35355338, %v996_v19  ;;  %1284 = vst [vmem:[%s2629_s16 + $0xc0] sm:$0xff] %v1154_v3  ;;  %v3200_v30 = vsub.f32 %v3198_v40, %v3199_v52  ;;  %v998_v52 = vadd.f32 %v2648_v46, %v2646_v21  ;;  %v3282_v46 = vld [vmem:[#allocation61_spill] sm:$0xff] }
 0x251   : > { %v1383_v21 = vmul.f32 0.35355338, %v1063_v32  ;;  %v3286_v32 = vld [vmem:[#allocation64_spill] sm:$0xff] }
 0x252   : > { %v1347_v13 = vmul.f32 0.35355338, %v3200_v30 }
 0x253   : > { %v1181_v20 = vpop.trf.xlu0 }
 0x254   : > { %1265 = vst [vmem:[%s2629_s16 + $0x28] sm:$0xff] %v1181_v20  ;;  %v555_v63 = vpop.trf.xlu1 }
 0x255   : > { %683 = vst [vmem:[#allocation2 + $0x3f0] sm:$0xff] %v555_v63  ;;  %v1125_v63 = vmul.f32 0.35355338, %v997_v4 }
 0x256   : > { %1426 = vxpose.xlu1.b32.cont [7/16] %v1346_v9, 128  ;;  %v3202_v9 = vld [vmem:[#allocation22_spill] sm:$0xff] }
 0x257   : > { %1394 = vxpose.xlu0.b32.cont [7/16] %v1330_v7, 128  ;;  %v3203_v19 = vsub.f32 %v3201_v33, %v3202_v9  ;;  %v2729_v7 = vld [vmem:[#allocation2 + $0x3d0] ss:$2 sm:$0xff]  ;;  %v1155_v40 = vpop.trf.xlu2  ;;  %v3205_v33 = vld [vmem:[#allocation9_spill] sm:$0xff]  ;;  %v3206_v9 = vld [vmem:[#allocation10_spill] sm:$0xff] }
 0x258   : > { %1236 = vxpose.xlu2.b32.cont [9/16] %v1124_v17, 128  ;;  %v2731_v17 = vld [vmem:[#allocation2 + $0x3d1] ss:$2 sm:$0xff]  ;;  %1288 = vst [vmem:[%s2629_s16 + $0xe0] sm:$0xff] %v1155_v40  ;;  %v999_v40 = vadd.f32 %v2676_v27, %v2674_v26  ;;  %v1384_v26 = vmul.f32 0.35355338, %v1064_v43 }
 0x259   : > { %v1331_v14 = vmul.f32 0.35355338, %v3203_v19  ;;  %v1065_v3 = vsub.f32 %v2729_v7, %v2731_v17  ;;  %v3207_v19 = vsub.f32 %v3205_v33, %v3206_v9  ;;  %v3210_v33 = vld [vmem:[#allocation12_spill] sm:$0xff]  ;;  %v3285_v27 = vld [vmem:[#allocation63_spill] sm:$0xff] }
 0x25b   : > { %v1182_v20 = vpop.trf.xlu0 }
 0x25c   : > { %1269 = vst [vmem:[%s2629_s16 + $0x48] sm:$0xff] %v1182_v20  ;;  %v556_v20 = vpop.trf.xlu1 }
 0x25d   : > { %684 = vst [vmem:[#allocation2 + $0x3f8] sm:$0xff] %v556_v20 }
 0x25e   : > { %1427 = vxpose.xlu1.b32.cont [8/16] %v1347_v13, 128  ;;  %v3204_v13 = vsub.f32 %v2280_v37, %v2282_v45  ;;  %v3208_v37 = vsub.f32 %v2306_v44, %v2308_v28  ;;  %v1000_v44 = vadd.f32 %v2705_v56, %v2703_v55  ;;  %v1385_v55 = vmul.f32 0.35355338, %v1065_v3 }
 0x25f   : > { %1395 = vxpose.xlu0.b32.cont [8/16] %v1331_v14, 128  ;;  %v1332_v14 = vmul.f32 0.35355338, %v3207_v19  ;;  %v1156_v20 = vpop.trf.xlu2  ;;  %v2757_v19 = vld [vmem:[#allocation2 + $0x3e1] ss:$2 sm:$0xff]  ;;  %v3288_v56 = vsub.f32 %v2595_v53, %v2597_v8 }
 0x260   : > { %1237 = vxpose.xlu2.b32.cont [10/16] %v1125_v63, 128  ;;  %v1348_v4 = vmul.f32 0.35355338, %v3204_v13  ;;  %v1126_v63 = vmul.f32 0.35355338, %v998_v52  ;;  %1292 = vst [vmem:[%s2629_s16 + $0x100] sm:$0xff] %v1156_v20  ;;  %v3209_v13 = vld [vmem:[#allocation11_spill] sm:$0xff] }
 0x261   : > { %v1349_v45 = vmul.f32 0.35355338, %v3208_v37  ;;  %v3211_v9 = vsub.f32 %v3209_v13, %v3210_v33  ;;  %v2755_v52 = vld [vmem:[#allocation2 + $0x3e0] ss:$2 sm:$0xff]  ;;  %v1371_v43 = vmul.f32 0.35355338, %v3288_v56 }
 0x263   : > { %v1183_v30 = vpop.trf.xlu0 }
 0x264   : > { %1273 = vst [vmem:[%s2629_s16 + $0x68] sm:$0xff] %v1183_v30 }
 0x266   : > { %1428 = vxpose.xlu1.b32.cont [9/16] %v1348_v4, 128  ;;  %v1333_v4 = vmul.f32 0.35355338, %v3211_v9  ;;  %v1128_v9 = vmul.f32 0.35355338, %v1000_v44 }
 0x267   : > { %1396 = vxpose.xlu0.b32.cont [9/16] %v1332_v14, 128  ;;  %v1127_v14 = vmul.f32 0.35355338, %v999_v40  ;;  %v1157_v20 = vpop.trf.xlu2  ;;  %v3214_v40 = vld [vmem:[#allocation16_spill] sm:$0xff] }
 0x268   : > { %1238 = vxpose.xlu2.b32.cont [11/16] %v1126_v63, 128  ;;  %v1066_v63 = vsub.f32 %v2755_v52, %v2757_v19  ;;  %1296 = vst [vmem:[%s2629_s16 + $0x120] sm:$0xff] %v1157_v20 }
 0x26b   : > { %v1184_v30 = vpop.trf.xlu0 }
 0x26c   : > { %1277 = vst [vmem:[%s2629_s16 + $0x88] sm:$0xff] %v1184_v30  ;;  %v3212_v30 = vsub.f32 %v2332_v12, %v2334_v61  ;;  %v3216_v12 = vsub.f32 %v2358_v31, %v2360_v58  ;;  %v1002_v31 = vadd.f32 %v2757_v19, %v2755_v52 }
 0x26e   : > { %1429 = vxpose.xlu1.b32.cont [10/16] %v1349_v45, 128  ;;  %v1350_v37 = vmul.f32 0.35355338, %v3212_v30  ;;  %v3213_v45 = vld [vmem:[#allocation15_spill] sm:$0xff]  ;;  %v1351_v61 = vmul.f32 0.35355338, %v3216_v12 }
 0x26f   : > { %1397 = vxpose.xlu0.b32.cont [10/16] %v1333_v4, 128  ;;  %v3215_v13 = vsub.f32 %v3213_v45, %v3214_v40  ;;  %v1001_v4 = vadd.f32 %v2731_v17, %v2729_v7  ;;  %v3217_v30 = vld [vmem:[#allocation19_spill] sm:$0xff]  ;;  %v3218_v45 = vld [vmem:[#allocation20_spill] sm:$0xff]  ;;  %v1386_v7 = vmul.f32 0.35355338, %v1066_v63 }
 0x270   : > { %1239 = vxpose.xlu2.b32.cont [12/16] %v1127_v14, 128  ;;  %v1158_v14 = vpop.trf.xlu2  ;;  %v2781_v40 = vld [vmem:[#allocation2 + $0x3f0] ss:$2 sm:$0xff] }
 0x271   : > { %v1334_v33 = vmul.f32 0.35355338, %v3215_v13  ;;  %1300 = vst [vmem:[%s2629_s16 + $0x140] sm:$0xff] %v1158_v14  ;;  %v2783_v13 = vld [vmem:[#allocation2 + $0x3f1] ss:$2 sm:$0xff] }
 0x272   : > { %v3221_v12 = vld [vmem:[#allocation23_spill] sm:$0xff] }
 0x273   : > { %v1185_v28 = vpop.trf.xlu0 }
 0x274   : > { %1281 = vst [vmem:[%s2629_s16 + $0xa8] sm:$0xff] %v1185_v28  ;;  %v1129_v28 = vmul.f32 0.35355338, %v1001_v4  ;;  %v3220_v4 = vsub.f32 %v2384_v16, %v2386_v23  ;;  %v3224_v16 = vsub.f32 %v2415_v22, %v2417_v36  ;;  %v3229_v22 = vld [vmem:[#allocation27_spill] sm:$0xff]  ;;  %v3230_v36 = vld [vmem:[#allocation28_spill] sm:$0xff] }
 0x276   : > { %1430 = vxpose.xlu1.b32.cont [11/16] %v1350_v37, 128  ;;  %v3219_v37 = vsub.f32 %v3217_v30, %v3218_v45  ;;  %v1352_v14 = vmul.f32 0.35355338, %v3220_v4  ;;  %v1353_v23 = vmul.f32 0.35355338, %v3224_v16 }
 0x277   : > { %1398 = vxpose.xlu0.b32.cont [11/16] %v1334_v33, 128  ;;  %v1067_v33 = vsub.f32 %v2781_v40, %v2783_v13 }
 0x278   : > { %1240 = vxpose.xlu2.b32.cont [13/16] %v1128_v9, 128  ;;  %v1335_v44 = vmul.f32 0.35355338, %v3219_v37  ;;  %v1159_v58 = vpop.trf.xlu2 }
 0x279   : > { %1304 = vst [vmem:[%s2629_s16 + $0x160] sm:$0xff] %v1159_v58  ;;  %v3225_v58 = vld [vmem:[#allocation25_spill] sm:$0xff]  ;;  %v1387_v3 = vmul.f32 0.35355338, %v1067_v33 }
 0x27b   : > { %v1186_v20 = vpop.trf.xlu0 }
 0x27c   : > { %1285 = vst [vmem:[%s2629_s16 + $0xc8] sm:$0xff] %v1186_v20  ;;  %v1130_v20 = vmul.f32 0.35355338, %v1002_v31 }
 0x27e   : > { %1431 = vxpose.xlu1.b32.cont [12/16] %v1351_v61, 128  ;;  %v3222_v61 = vld [vmem:[#allocation24_spill] sm:$0xff] }
 0x27f   : > { %1399 = vxpose.xlu0.b32.cont [12/16] %v1335_v44, 128  ;;  %v3223_v30 = vsub.f32 %v3221_v12, %v3222_v61  ;;  %v3228_v61 = vsub.f32 %v2445_v5, %v2447_v62  ;;  %v3235_v5 = vsub.f32 %v2475_v38, %v2477_v29  ;;  %v3242_v29 = vsub.f32 %v2501_v48, %v2503_v34 }
 0x280   : > { %1241 = vxpose.xlu2.b32.cont [14/16] %v1129_v28, 128  ;;  %v1003_v28 = vadd.f32 %v2783_v13, %v2781_v40  ;;  %v1160_v37 = vpop.trf.xlu2 }
 0x281   : > { %v1336_v45 = vmul.f32 0.35355338, %v3223_v30  ;;  %1308 = vst [vmem:[%s2629_s16 + $0x180] sm:$0xff] %v1160_v37  ;;  %v1354_v30 = vmul.f32 0.35355338, %v3228_v61  ;;  %v3232_v37 = vld [vmem:[#allocation31_spill] sm:$0xff] }
 0x282   : > { %v1131_v31 = vmul.f32 0.35355338, %v1003_v28  ;;  %v1355_v62 = vmul.f32 0.35355338, %v3235_v5  ;;  %v3240_v61 = vld [vmem:[#allocation36_spill] sm:$0xff] }
 0x283   : > { %v1187_v9 = vpop.trf.xlu0  ;;  %v1372_v38 = vmul.f32 0.35355338, %v3242_v29 }
 0x284   : > { %1289 = vst [vmem:[%s2629_s16 + $0xe8] sm:$0xff] %v1187_v9  ;;  %v3226_v9 = vld [vmem:[#allocation26_spill] sm:$0xff] }
 0x285   : > { %v3227_v4 = vsub.f32 %v3225_v58, %v3226_v9  ;;  %v3236_v9 = vld [vmem:[#allocation29_spill] sm:$0xff] }
 0x286   : > { %1432 = vxpose.xlu1.b32.cont [13/16] %v1352_v14, 128 }
 0x287   : > { %1400 = vxpose.xlu0.b32.cont [13/16] %v1336_v45, 128  ;;  %v1337_v14 = vmul.f32 0.35355338, %v3227_v4  ;;  %v3231_v45 = vsub.f32 %v3229_v22, %v3230_v36  ;;  %v3237_v4 = vld [vmem:[#allocation30_spill] sm:$0xff] }
 0x288   : > { %1242 = vxpose.xlu2.b32.cont [15/16] %v1130_v20, 128  ;;  %v1161_v20 = vpop.trf.xlu2 }
 0x289   : > { %1312 = vst [vmem:[%s2629_s16 + $0x1a0] sm:$0xff] %v1161_v20  ;;  %v1338_v28 = vmul.f32 0.35355338, %v3231_v45 }
 0x28b   : > { %v1188_v44 = vpop.trf.xlu0 }
 0x28c   : > { %1293 = vst [vmem:[%s2629_s16 + $0x108] sm:$0xff] %v1188_v44  ;;  %v3233_v44 = vld [vmem:[#allocation32_spill] sm:$0xff] }
 0x28d   : > { %v3234_v16 = vsub.f32 %v3232_v37, %v3233_v44  ;;  %v3244_v37 = vld [vmem:[#allocation40_spill] sm:$0xff] }
 0x28e   : > { %1433 = vxpose.xlu1.b32.cont [14/16] %v1353_v23, 128 }
 0x28f   : > { %1401 = vxpose.xlu0.b32.cont [14/16] %v1337_v14, 128  ;;  %v1356_v23 = vmul.f32 0.35355338, %v3234_v16  ;;  %v3238_v14 = vsub.f32 %v3236_v9, %v3237_v4  ;;  %v3248_v9 = vld [vmem:[#allocation42_spill] sm:$0xff] }
 0x290   : > { %1243 = vxpose.xlu2.b32.end [16/16] %v1131_v31, 128  ;;  %v1162_v31 = vpop.trf.xlu2 }
 0x291   : > { %1316 = vst [vmem:[%s2629_s16 + $0x1c0] sm:$0xff] %v1162_v31  ;;  %v1339_v20 = vmul.f32 0.35355338, %v3238_v14 }
 0x293   : > { %v1189_v12 = vpop.trf.xlu0 }
 0x294   : > { %1297 = vst [vmem:[%s2629_s16 + $0x128] sm:$0xff] %v1189_v12  ;;  %v3239_v12 = vld [vmem:[#allocation35_spill] sm:$0xff] }
 0x296   : > { %1434 = vxpose.xlu1.b32.cont [15/16] %v1354_v30, 128  ;;  %v3241_v30 = vsub.f32 %v3239_v12, %v3240_v61  ;;  %v3250_v12 = vsub.f32 %v2549_v47, %v2551_v35  ;;  %v3252_v61 = vld [vmem:[#allocation46_spill] sm:$0xff]  ;;  %v3255_v47 = vld [vmem:[#allocation47_spill] sm:$0xff] }
 0x297   : > { %1402 = vxpose.xlu0.b32.cont [15/16] %v1338_v28, 128  ;;  %v3243_v28 = vld [vmem:[#allocation39_spill] sm:$0xff] }
 0x298   : > { %1452 = vxpose.xlu2.b32.start [1/16] %v1356_v23, 128  ;;  %v1357_v22 = vmul.f32 0.35355338, %v3241_v30  ;;  %v1163_v36 = vpop.trf.xlu2  ;;  %v3245_v44 = vsub.f32 %v3243_v28, %v3244_v37  ;;  %v1212_v23 = vpop.trf.xlu1  ;;  %v3256_v28 = vld [vmem:[#allocation48_spill] sm:$0xff] }
 0x299   : > { %1320 = vst [vmem:[%s2629_s16 + $0x1e0] sm:$0xff] %v1163_v36  ;;  %v3257_v37 = vsub.f32 %v3255_v47, %v3256_v28 }
 0x29a   : > { %v1358_v16 = vmul.f32 0.35355338, %v3245_v44  ;;  %1262 = vst [vmem:[%s2629_s16 + $0x10] sm:$0xff] %v1212_v23 }
 0x29b   : > { %v1190_v58 = vpop.trf.xlu0  ;;  %v1361_v44 = vmul.f32 0.35355338, %v3257_v37 }
 0x29c   : > { %1301 = vst [vmem:[%s2629_s16 + $0x148] sm:$0xff] %v1190_v58  ;;  %v3246_v58 = vsub.f32 %v2525_v54, %v2527_v0  ;;  %v1374_v54 = vmul.f32 0.35355338, %v3250_v12  ;;  %v3251_v0 = vld [vmem:[#allocation45_spill] sm:$0xff] }
 0x29d   : > { %v3253_v30 = vsub.f32 %v3251_v0, %v3252_v61 }
 0x29e   : > { %1435 = vxpose.xlu1.b32.end [16/16] %v1355_v62, 128  ;;  %v1373_v5 = vmul.f32 0.35355338, %v3246_v58  ;;  %v3247_v62 = vld [vmem:[#allocation41_spill] sm:$0xff]  ;;  %v3258_v58 = vsub.f32 %v2605_v39, %v2607_v60  ;;  %v1377_v60 = vmul.f32 0.35355338, %v1057_v49  ;;  %v3262_v39 = vld [vmem:[#allocation55_spill] sm:$0xff] }
 0x29f   : > { %1403 = vxpose.xlu0.b32.end [16/16] %v1339_v20, 128  ;;  %v3249_v34 = vsub.f32 %v3247_v62, %v3248_v9  ;;  %v3266_v49 = vld [vmem:[#allocation44_spill] sm:$0xff] }
 0x2a0   : > { %1453 = vxpose.xlu2.b32.cont [2/16] %v1357_v22, 128  ;;  %v1213_v4 = vpop.trf.xlu1  ;;  %v1360_v22 = vmul.f32 0.35355338, %v3253_v30  ;;  %v3267_v30 = vsub.f32 %v3265_v51, %v3266_v49 }
 0x2a1   : > { %v1359_v48 = vmul.f32 0.35355338, %v3249_v34  ;;  %1266 = vst [vmem:[%s2629_s16 + $0x30] sm:$0xff] %v1213_v4 }
 0x2a3   : > { %v1191_v45 = vpop.trf.xlu0 }
 0x2a4   : > { %1305 = vst [vmem:[%s2629_s16 + $0x168] sm:$0xff] %v1191_v45 }
 0x2a7   : > { %1484 = vxpose.xlu0.b32.start [1/16] %v1372_v38, 128  ;;  %v3254_v38 = vsub.f32 %v2575_v42, %v2577_v18  ;;  %v1376_v42 = vmul.f32 0.35355338, %v3258_v58  ;;  %v3259_v18 = vld [vmem:[#allocation51_spill] sm:$0xff] }
 0x2a8   : > { %1454 = vxpose.xlu2.b32.cont [3/16] %v1358_v16, 128  ;;  %v1214_v36 = vpop.trf.xlu1 }
 0x2a9   : > { %1270 = vst [vmem:[%s2629_s16 + $0x50] sm:$0xff] %v1214_v36  ;;  %v1375_v35 = vmul.f32 0.35355338, %v3254_v38  ;;  %v3270_v38 = vsub.f32 %v3268_v25, %v3269_v41 }
 0x2ab   : > { %v1192_v31 = vpop.trf.xlu0 }
 0x2ac   : > { %1309 = vst [vmem:[%s2629_s16 + $0x188] sm:$0xff] %v1192_v31 }
 0x2af   : > { %1485 = vxpose.xlu0.b32.cont [2/16] %v1373_v5, 128  ;;  %v3260_v5 = vld [vmem:[#allocation52_spill] sm:$0xff] }
 0x2b0   : > { %1455 = vxpose.xlu2.b32.cont [4/16] %v1359_v48, 128  ;;  %v1215_v16 = vpop.trf.xlu1  ;;  %v3261_v62 = vsub.f32 %v3259_v18, %v3260_v5  ;;  %v3275_v18 = vsub.f32 %v2613_v2, %v2615_v1  ;;  %v3277_v5 = vld [vmem:[#allocation58_spill] sm:$0xff]  ;;  %v1382_v1 = vmul.f32 0.35355338, %v1062_v24  ;;  %v3279_v2 = vld [vmem:[#allocation59_spill] sm:$0xff] }
 0x2b1   : > { %v1244_v14 = vpop.trf.xlu2  ;;  %1274 = vst [vmem:[%s2629_s16 + $0x70] sm:$0xff] %v1215_v16  ;;  %v3274_v16 = vsub.f32 %v3272_v6, %v3273_v10  ;;  %v3283_v24 = vld [vmem:[#allocation62_spill] sm:$0xff] }
 0x2b2   : > { %1263 = vst [vmem:[%s2629_s16 + $0x18] sm:$0xff] %v1244_v14  ;;  %v1362_v9 = vmul.f32 0.35355338, %v3261_v62  ;;  %v3263_v14 = vld [vmem:[#allocation56_spill] sm:$0xff] }
 0x2b3   : > { %v1193_v20 = vpop.trf.xlu0 }
 0x2b4   : > { %1313 = vst [vmem:[%s2629_s16 + $0x1a8] sm:$0xff] %v1193_v20  ;;  %v3264_v20 = vsub.f32 %v3262_v39, %v3263_v14 }
 0x2b6   : > { %v1363_v12 = vmul.f32 0.35355338, %v3264_v20 }
 0x2b7   : > { %1486 = vxpose.xlu0.b32.cont [3/16] %v1374_v54, 128 }
 0x2b8   : > { %1456 = vxpose.xlu2.b32.cont [5/16] %v1360_v22, 128  ;;  %v1216_v34 = vpop.trf.xlu1  ;;  %v1364_v22 = vmul.f32 0.35355338, %v3267_v30  ;;  %v3287_v30 = vsub.f32 %v3285_v27, %v3286_v32 }
 0x2b9   : > { %v1245_v45 = vpop.trf.xlu2  ;;  %1278 = vst [vmem:[%s2629_s16 + $0x90] sm:$0xff] %v1216_v34 }
 0x2ba   : > { %1267 = vst [vmem:[%s2629_s16 + $0x38] sm:$0xff] %v1245_v45 }
 0x2bb   : > { %v1194_v29 = vpop.trf.xlu0 }
 0x2bc   : > { %1317 = vst [vmem:[%s2629_s16 + $0x1c8] sm:$0xff] %v1194_v29 }
 0x2bf   : > { %1487 = vxpose.xlu0.b32.cont [4/16] %v1375_v35, 128  ;;  %v1365_v35 = vmul.f32 0.35355338, %v3270_v38 }
 0x2c0   : > { %1457 = vxpose.xlu2.b32.cont [6/16] %v1361_v44, 128  ;;  %v1217_v54 = vpop.trf.xlu1  ;;  %v3271_v44 = vsub.f32 %v2585_v59, %v2587_v57  ;;  %v1381_v59 = vmul.f32 0.35355338, %v3275_v18  ;;  %v3276_v57 = vld [vmem:[#allocation57_spill] sm:$0xff] }
 0x2c1   : > { %v1246_v23 = vpop.trf.xlu2  ;;  %1282 = vst [vmem:[%s2629_s16 + $0xb0] sm:$0xff] %v1217_v54  ;;  %v3278_v62 = vsub.f32 %v3276_v57, %v3277_v5 }
 0x2c2   : > { %1271 = vst [vmem:[%s2629_s16 + $0x58] sm:$0xff] %v1246_v23  ;;  %v1380_v15 = vmul.f32 0.35355338, %v3271_v44  ;;  %v1366_v23 = vmul.f32 0.35355338, %v3274_v16 }
 0x2c3   : > { %v1195_v31 = vpop.trf.xlu0 }
 0x2c4   : > { %1321 = vst [vmem:[%s2629_s16 + $0x1e8] sm:$0xff] %v1195_v31 }
 0x2c7   : > { %1488 = vxpose.xlu0.b32.cont [5/16] %v1376_v42, 128 }
 0x2c8   : > { %1458 = vxpose.xlu2.b32.cont [7/16] %v1362_v9, 128  ;;  %v1218_v36 = vpop.trf.xlu1  ;;  %v1367_v9 = vmul.f32 0.35355338, %v3278_v62 }
 0x2c9   : > { %v1247_v48 = vpop.trf.xlu2  ;;  %1286 = vst [vmem:[%s2629_s16 + $0xd0] sm:$0xff] %v1218_v36 }
 0x2ca   : > { %1275 = vst [vmem:[%s2629_s16 + $0x78] sm:$0xff] %v1247_v48 }
 0x2cb   : > { %v1404_v4 = vpop.trf.xlu0 }
 0x2cc   : > { %1706 = vst [vmem:[%s2629_s16 + $0x200] sm:$0xff] %v1404_v4 }
 0x2cf   : > { %1489 = vxpose.xlu0.b32.cont [6/16] %v1377_v60, 128  ;;  %v3280_v60 = vld [vmem:[#allocation60_spill] sm:$0xff] }
 0x2d0   : > { %1459 = vxpose.xlu2.b32.cont [8/16] %v1363_v12, 128  ;;  %v1219_v47 = vpop.trf.xlu1  ;;  %v3281_v39 = vsub.f32 %v3279_v2, %v3280_v60 }
 0x2d1   : > { %v1248_v0 = vpop.trf.xlu2  ;;  %1290 = vst [vmem:[%s2629_s16 + $0xf0] sm:$0xff] %v1219_v47 }
 0x2d2   : > { %1279 = vst [vmem:[%s2629_s16 + $0x98] sm:$0xff] %v1248_v0  ;;  %v1368_v14 = vmul.f32 0.35355338, %v3281_v39  ;;  %v3284_v0 = vsub.f32 %v3282_v46, %v3283_v24 }
 0x2d3   : > { %v1405_v61 = vpop.trf.xlu0 }
 0x2d4   : > { %1710 = vst [vmem:[%s2629_s16 + $0x220] sm:$0xff] %v1405_v61  ;;  %v1369_v61 = vmul.f32 0.35355338, %v3284_v0 }
 0x2d7   : > { %1490 = vxpose.xlu0.b32.cont [7/16] %v1378_v50, 128 }
 0x2d8   : > { %1460 = vxpose.xlu2.b32.cont [9/16] %v1364_v22, 128  ;;  %v1220_v31 = vpop.trf.xlu1  ;;  %v1370_v22 = vmul.f32 0.35355338, %v3287_v30 }
 0x2d9   : > { %v1249_v45 = vpop.trf.xlu2  ;;  %1294 = vst [vmem:[%s2629_s16 + $0x110] sm:$0xff] %v1220_v31 }
 0x2da   : > { %1283 = vst [vmem:[%s2629_s16 + $0xb8] sm:$0xff] %v1249_v45 }
 0x2db   : > { %v1406_v29 = vpop.trf.xlu0 }
 0x2dc   : > { %1714 = vst [vmem:[%s2629_s16 + $0x240] sm:$0xff] %v1406_v29 }
 0x2df   : > { %1491 = vxpose.xlu0.b32.cont [8/16] %v1379_v11, 128 }
 0x2e0   : > { %1461 = vxpose.xlu2.b32.cont [10/16] %v1365_v35, 128  ;;  %v1221_v34 = vpop.trf.xlu1 }
 0x2e1   : > { %v1250_v28 = vpop.trf.xlu2  ;;  %1298 = vst [vmem:[%s2629_s16 + $0x130] sm:$0xff] %v1221_v34 }
 0x2e2   : > { %1287 = vst [vmem:[%s2629_s16 + $0xd8] sm:$0xff] %v1250_v28 }
 0x2e3   : > { %v1407_v37 = vpop.trf.xlu0 }
 0x2e4   : > { %1718 = vst [vmem:[%s2629_s16 + $0x260] sm:$0xff] %v1407_v37 }
 0x2e7   : > { %1492 = vxpose.xlu0.b32.cont [9/16] %v1380_v15, 128 }
 0x2e8   : > { %1462 = vxpose.xlu2.b32.cont [11/16] %v1366_v23, 128  ;;  %v1222_v20 = vpop.trf.xlu1 }
 0x2e9   : > { %v1251_v58 = vpop.trf.xlu2  ;;  %1302 = vst [vmem:[%s2629_s16 + $0x150] sm:$0xff] %v1222_v20 }
 0x2ea   : > { %1291 = vst [vmem:[%s2629_s16 + $0xf8] sm:$0xff] %v1251_v58 }
 0x2eb   : > { %v1408_v42 = vpop.trf.xlu0 }
 0x2ec   : > { %1722 = vst [vmem:[%s2629_s16 + $0x280] sm:$0xff] %v1408_v42 }
 0x2ef   : > { %1493 = vxpose.xlu0.b32.cont [10/16] %v1381_v59, 128 }
 0x2f0   : > { %1463 = vxpose.xlu2.b32.cont [12/16] %v1367_v9, 128  ;;  %v1223_v50 = vpop.trf.xlu1 }
 0x2f1   : > { %v1252_v48 = vpop.trf.xlu2  ;;  %1306 = vst [vmem:[%s2629_s16 + $0x170] sm:$0xff] %v1223_v50 }
 0x2f2   : > { %1295 = vst [vmem:[%s2629_s16 + $0x118] sm:$0xff] %v1252_v48 }
 0x2f3   : > { %v1409_v4 = vpop.trf.xlu0 }
 0x2f4   : > { %1726 = vst [vmem:[%s2629_s16 + $0x2a0] sm:$0xff] %v1409_v4 }
 0x2f7   : > { %1494 = vxpose.xlu0.b32.cont [11/16] %v1382_v1, 128 }
 0x2f8   : > { %1464 = vxpose.xlu2.b32.cont [13/16] %v1368_v14, 128  ;;  %v1224_v36 = vpop.trf.xlu1 }
 0x2f9   : > { %v1253_v12 = vpop.trf.xlu2  ;;  %1310 = vst [vmem:[%s2629_s16 + $0x190] sm:$0xff] %v1224_v36 }
 0x2fa   : > { %1299 = vst [vmem:[%s2629_s16 + $0x138] sm:$0xff] %v1253_v12 }
 0x2fb   : > { %v1410_v54 = vpop.trf.xlu0 }
 0x2fc   : > { %1730 = vst [vmem:[%s2629_s16 + $0x2c0] sm:$0xff] %v1410_v54 }
 0x2ff   : > { %1495 = vxpose.xlu0.b32.cont [12/16] %v1383_v21, 128 }
 0x300   : > { %1465 = vxpose.xlu2.b32.cont [14/16] %v1369_v61, 128  ;;  %v1225_v11 = vpop.trf.xlu1 }
 0x301   : > { %v1254_v51 = vpop.trf.xlu2  ;;  %1314 = vst [vmem:[%s2629_s16 + $0x1b0] sm:$0xff] %v1225_v11 }
 0x302   : > { %1303 = vst [vmem:[%s2629_s16 + $0x158] sm:$0xff] %v1254_v51 }
 0x303   : > { %v1411_v49 = vpop.trf.xlu0 }
 0x304   : > { %1734 = vst [vmem:[%s2629_s16 + $0x2e0] sm:$0xff] %v1411_v49 }
 0x307   : > { %1496 = vxpose.xlu0.b32.cont [13/16] %v1384_v26, 128 }
 0x308   : > { %1466 = vxpose.xlu2.b32.cont [15/16] %v1370_v22, 128  ;;  %v1226_v17 = vpop.trf.xlu1 }
 0x309   : > { %v1255_v45 = vpop.trf.xlu2  ;;  %1318 = vst [vmem:[%s2629_s16 + $0x1d0] sm:$0xff] %v1226_v17 }
 0x30a   : > { %1307 = vst [vmem:[%s2629_s16 + $0x178] sm:$0xff] %v1255_v45 }
 0x30b   : > { %v1412_v29 = vpop.trf.xlu0 }
 0x30c   : > { %1738 = vst [vmem:[%s2629_s16 + $0x300] sm:$0xff] %v1412_v29 }
 0x30f   : > { %1497 = vxpose.xlu0.b32.cont [14/16] %v1385_v55, 128 }
 0x310   : > { %1467 = vxpose.xlu2.b32.end [16/16] %v1371_v43, 128  ;;  %v1227_v52 = vpop.trf.xlu1 }
 0x311   : > { %v1256_v25 = vpop.trf.xlu2  ;;  %1322 = vst [vmem:[%s2629_s16 + $0x1f0] sm:$0xff] %v1227_v52 }
 0x312   : > { %1311 = vst [vmem:[%s2629_s16 + $0x198] sm:$0xff] %v1256_v25 }
 0x313   : > { %v1413_v41 = vpop.trf.xlu0 }
 0x314   : > { %1742 = vst [vmem:[%s2629_s16 + $0x320] sm:$0xff] %v1413_v41 }
 0x317   : > { %1498 = vxpose.xlu0.b32.cont [15/16] %v1386_v7, 128 }
 0x318   : > { %v1436_v38 = vpop.trf.xlu1 }
 0x319   : > { %v1257_v8 = vpop.trf.xlu2  ;;  %1707 = vst [vmem:[%s2629_s16 + $0x208] sm:$0xff] %v1436_v38 }
 0x31a   : > { %1315 = vst [vmem:[%s2629_s16 + $0x1b8] sm:$0xff] %v1257_v8 }
 0x31b   : > { %v1414_v53 = vpop.trf.xlu0 }
 0x31c   : > { %1746 = vst [vmem:[%s2629_s16 + $0x340] sm:$0xff] %v1414_v53 }
 0x31f   : > { %1499 = vxpose.xlu0.b32.end [16/16] %v1387_v3, 128 }
 0x320   : > { %v1437_v40 = vpop.trf.xlu1 }
 0x321   : > { %v1258_v19 = vpop.trf.xlu2  ;;  %1711 = vst [vmem:[%s2629_s16 + $0x228] sm:$0xff] %v1437_v40 }
 0x322   : > { %1319 = vst [vmem:[%s2629_s16 + $0x1d8] sm:$0xff] %v1258_v19 }
 0x323   : > { %v1415_v63 = vpop.trf.xlu0 }
 0x324   : > { %1750 = vst [vmem:[%s2629_s16 + $0x360] sm:$0xff] %v1415_v63 }
 0x328   : > { %v1438_v28 = vpop.trf.xlu1 }
 0x329   : > { %v1259_v35 = vpop.trf.xlu2  ;;  %1715 = vst [vmem:[%s2629_s16 + $0x248] sm:$0xff] %v1438_v28 }
 0x32a   : > { %1323 = vst [vmem:[%s2629_s16 + $0x1f8] sm:$0xff] %v1259_v35 }
 0x32b   : > { %v1416_v47 = vpop.trf.xlu0 }
 0x32c   : > { %1754 = vst [vmem:[%s2629_s16 + $0x380] sm:$0xff] %v1416_v47 }
 0x330   : > { %v1439_v15 = vpop.trf.xlu1 }
 0x331   : > { %v1468_v13 = vpop.trf.xlu2  ;;  %1719 = vst [vmem:[%s2629_s16 + $0x268] sm:$0xff] %v1439_v15 }
 0x332   : > { %1708 = vst [vmem:[%s2629_s16 + $0x210] sm:$0xff] %v1468_v13 }
 0x333   : > { %v1417_v33 = vpop.trf.xlu0 }
 0x334   : > { %1758 = vst [vmem:[%s2629_s16 + $0x3a0] sm:$0xff] %v1417_v33 }
 0x338   : > { %v1440_v16 = vpop.trf.xlu1 }
 0x339   : > { %v1469_v37 = vpop.trf.xlu2  ;;  %1723 = vst [vmem:[%s2629_s16 + $0x288] sm:$0xff] %v1440_v16 }
 0x33a   : > { %1712 = vst [vmem:[%s2629_s16 + $0x230] sm:$0xff] %v1469_v37 }
 0x33b   : > { %v1418_v44 = vpop.trf.xlu0 }
 0x33c   : > { %1762 = vst [vmem:[%s2629_s16 + $0x3c0] sm:$0xff] %v1418_v44 }
 0x340   : > { %v1441_v58 = vpop.trf.xlu1 }
 0x341   : > { %v1470_v6 = vpop.trf.xlu2  ;;  %1727 = vst [vmem:[%s2629_s16 + $0x2a8] sm:$0xff] %v1441_v58 }
 0x342   : > { %1716 = vst [vmem:[%s2629_s16 + $0x250] sm:$0xff] %v1470_v6 }
 0x343   : > { %v1419_v10 = vpop.trf.xlu0 }
 0x344   : > { %1766 = vst [vmem:[%s2629_s16 + $0x3e0] sm:$0xff] %v1419_v10 }
 0x348   : > { %v1442_v59 = vpop.trf.xlu1 }
 0x349   : > { %v1471_v23 = vpop.trf.xlu2  ;;  %1731 = vst [vmem:[%s2629_s16 + $0x2c8] sm:$0xff] %v1442_v59 }
 0x34a   : > { %1720 = vst [vmem:[%s2629_s16 + $0x270] sm:$0xff] %v1471_v23 }
 0x34b   : > { %v1500_v31 = vpop.trf.xlu0 }
 0x34c   : > { %1709 = vst [vmem:[%s2629_s16 + $0x218] sm:$0xff] %v1500_v31 }
 0x350   : > { %v1443_v62 = vpop.trf.xlu1 }
 0x351   : > { %v1472_v42 = vpop.trf.xlu2  ;;  %1735 = vst [vmem:[%s2629_s16 + $0x2e8] sm:$0xff] %v1443_v62 }
 0x352   : > { %1724 = vst [vmem:[%s2629_s16 + $0x290] sm:$0xff] %v1472_v42 }
 0x353   : > { %v1501_v18 = vpop.trf.xlu0 }
 0x354   : > { %1713 = vst [vmem:[%s2629_s16 + $0x238] sm:$0xff] %v1501_v18 }
 0x358   : > { %v1444_v48 = vpop.trf.xlu1 }
 0x359   : > { %v1473_v57 = vpop.trf.xlu2  ;;  %1739 = vst [vmem:[%s2629_s16 + $0x308] sm:$0xff] %v1444_v48 }
 0x35a   : > { %1728 = vst [vmem:[%s2629_s16 + $0x2b0] sm:$0xff] %v1473_v57 }
 0x35b   : > { %v1502_v5 = vpop.trf.xlu0 }
 0x35c   : > { %1717 = vst [vmem:[%s2629_s16 + $0x258] sm:$0xff] %v1502_v5 }
 0x360   : > { %v1445_v2 = vpop.trf.xlu1 }
 0x361   : > { %v1474_v9 = vpop.trf.xlu2  ;;  %1743 = vst [vmem:[%s2629_s16 + $0x328] sm:$0xff] %v1445_v2 }
 0x362   : > { %1732 = vst [vmem:[%s2629_s16 + $0x2d0] sm:$0xff] %v1474_v9 }
 0x363   : > { %v1503_v34 = vpop.trf.xlu0 }
 0x364   : > { %1721 = vst [vmem:[%s2629_s16 + $0x278] sm:$0xff] %v1503_v34 }
 0x368   : > { %v1446_v14 = vpop.trf.xlu1 }
 0x369   : > { %v1475_v4 = vpop.trf.xlu2  ;;  %1747 = vst [vmem:[%s2629_s16 + $0x348] sm:$0xff] %v1446_v14 }
 0x36a   : > { %1736 = vst [vmem:[%s2629_s16 + $0x2f0] sm:$0xff] %v1475_v4 }
 0x36b   : > { %v1504_v1 = vpop.trf.xlu0 }
 0x36c   : > { %1725 = vst [vmem:[%s2629_s16 + $0x298] sm:$0xff] %v1504_v1 }
 0x370   : > { %v1447_v54 = vpop.trf.xlu1 }
 0x371   : > { %v1476_v60 = vpop.trf.xlu2  ;;  %1751 = vst [vmem:[%s2629_s16 + $0x368] sm:$0xff] %v1447_v54 }
 0x372   : > { %1740 = vst [vmem:[%s2629_s16 + $0x310] sm:$0xff] %v1476_v60 }
 0x373   : > { %v1505_v39 = vpop.trf.xlu0 }
 0x374   : > { %1729 = vst [vmem:[%s2629_s16 + $0x2b8] sm:$0xff] %v1505_v39 }
 0x378   : > { %v1448_v24 = vpop.trf.xlu1 }
 0x379   : > { %v1477_v20 = vpop.trf.xlu2  ;;  %1755 = vst [vmem:[%s2629_s16 + $0x388] sm:$0xff] %v1448_v24 }
 0x37a   : > { %1744 = vst [vmem:[%s2629_s16 + $0x330] sm:$0xff] %v1477_v20 }
 0x37b   : > { %v1506_v12 = vpop.trf.xlu0 }
 0x37c   : > { %1733 = vst [vmem:[%s2629_s16 + $0x2d8] sm:$0xff] %v1506_v12 }
 0x380   : > { %v1449_v50 = vpop.trf.xlu1 }
 0x381   : > { %v1478_v21 = vpop.trf.xlu2  ;;  %1759 = vst [vmem:[%s2629_s16 + $0x3a8] sm:$0xff] %v1449_v50 }
 0x382   : > { %1748 = vst [vmem:[%s2629_s16 + $0x350] sm:$0xff] %v1478_v21 }
 0x383   : > { %v1507_v46 = vpop.trf.xlu0 }
 0x384   : > { %1737 = vst [vmem:[%s2629_s16 + $0x2f8] sm:$0xff] %v1507_v46 }
 0x388   : > { %v1450_v26 = vpop.trf.xlu1 }
 0x389   : > { %v1479_v0 = vpop.trf.xlu2  ;;  %1763 = vst [vmem:[%s2629_s16 + $0x3c8] sm:$0xff] %v1450_v26 }
 0x38a   : > { %1752 = vst [vmem:[%s2629_s16 + $0x370] sm:$0xff] %v1479_v0 }
 0x38b   : > { %v1508_v61 = vpop.trf.xlu0 }
 0x38c   : > { %1741 = vst [vmem:[%s2629_s16 + $0x318] sm:$0xff] %v1508_v61 }
 0x390   : > { %v1451_v30 = vpop.trf.xlu1 }
 0x391   : > { %v1480_v51 = vpop.trf.xlu2  ;;  %1767 = vst [vmem:[%s2629_s16 + $0x3e8] sm:$0xff] %v1451_v30 }
 0x392   : > { %1756 = vst [vmem:[%s2629_s16 + $0x390] sm:$0xff] %v1480_v51 }
 0x393   : > { %v1509_v49 = vpop.trf.xlu0 }
 0x394   : > { %1745 = vst [vmem:[%s2629_s16 + $0x338] sm:$0xff] %v1509_v49 }
 0x399   : > { %v1481_v27 = vpop.trf.xlu2 }
 0x39a   : > { %1760 = vst [vmem:[%s2629_s16 + $0x3b0] sm:$0xff] %v1481_v27 }
 0x39b   : > { %v1510_v32 = vpop.trf.xlu0 }
 0x39c   : > { %1749 = vst [vmem:[%s2629_s16 + $0x358] sm:$0xff] %v1510_v32 }
 0x3a1   : > { %v1482_v22 = vpop.trf.xlu2 }
 0x3a2   : > { %1764 = vst [vmem:[%s2629_s16 + $0x3d0] sm:$0xff] %v1482_v22 }
 0x3a3   : > { %v1511_v36 = vpop.trf.xlu0 }
 0x3a4   : > { %1753 = vst [vmem:[%s2629_s16 + $0x378] sm:$0xff] %v1511_v36 }
 0x3a9   : > { %v1483_v45 = vpop.trf.xlu2 }
 0x3aa   : > { %1768 = vst [vmem:[%s2629_s16 + $0x3f0] sm:$0xff] %v1483_v45 }
 0x3ab   : > { %v1512_v29 = vpop.trf.xlu0 }
 0x3ac   : > { %1757 = vst [vmem:[%s2629_s16 + $0x398] sm:$0xff] %v1512_v29 }
 0x3b3   : > { %v1513_v55 = vpop.trf.xlu0 }
 0x3b4   : > { %1761 = vst [vmem:[%s2629_s16 + $0x3b8] sm:$0xff] %v1513_v55 }
 0x3bb   : > { %v1514_v56 = vpop.trf.xlu0 }
 0x3bc   : > { %1765 = vst [vmem:[%s2629_s16 + $0x3d8] sm:$0xff] %v1514_v56 }
 0x3c3   : > { %v1515_v43 = vpop.trf.xlu0 }
 0x3c4   : > { %1769 = vst [vmem:[%s2629_s16 + $0x3f8] sm:$0xff] %v1515_v43 }
 0x3c5   : > { %1900 = shalt.err (!%p1897_p13)
}
 0x3c6   : > { %s1959_s4 = smov 512   ;;  %s1960_s5 = smov 32  }
 0x3c7   : > { %1779 = dma.vmem_to_hbm [thread:$0]  (%p2022_p9), %s1600_s24, 16384, %s1602_s25, %s1582_s26, %s1959_s4, %s1959_s4, %s1960_s5  }
 0x3c8 PF: > { %s1616_s12 = sand.u32 1, %s1935_s6   ;;  %p1786_p0 = pnand %p1699_p12, %p2029_p11 }
 0x3c9   : > { %s1617_s13 = scalar_lea.sflag [#allocation5], %s1616_s12 }
 0x3ca   : > { %p1787_p1 = pneg %p1786_p0 }
 0x3cc   : > { %1930 = dma.done.wait (%p1787_p1), %s1617_s13, 16384  }
 0x3cd   : > { %1932 = vsyncadd (%p1787_p1), %s1617_s13, 4294950912  ;;  %s17_s11 = sadd.s32 1, %s1955_s11   ;;  %s3289_s6 = smov %s1939_s7 }
 0x3ce   : > { %p14_p2 = scmp.ge.s32.totalorder %s17_s11, 4   ;;  %s3290_s7 = smov %s1943_s8 }
 0x3cf   : > { %s3291_s8 = smov %s2027_s20  ;;  %s3292_s9 = smov %s1951_s10 }
 0x3d0   : > { %s3293_s10 = smov %s3295_s14  ;;  %16 = sbr.rel (!%p14_p2) target bundleno = 6 (0x6), region = 197 }
 0x3d5   :  { %1623 = vsyncpa [#allocation4], 1 }
 0x3d6   :  { %1625 = vsyncpa [#allocation4 + $0x1], 1 }
 0x3d7   :  { %1626 = vsyncpa [#allocation5], 1 }
 0x3d8   :  { %1628 = vsyncpa [#allocation5 + $0x1], 1 }

</bundles_post_ra>
